<compile_context>
chip_gen: v5e
topology: v5e:2x2
jax: 0.10.0
libtpu: 0.0.40
codegen_flags: <defaults>
</compile_context>

<pallas_src>
import jax
import jax.numpy as jnp
from jax import lax
from jax.experimental import pallas as pl
from jax.experimental.pallas import tpu as pltpu

N = 16            # number of cities / gene length (power of two)
LOG2N = 4         # log2(N), for flat-pair-index bit arithmetic
NN = N * N        # flattened (a, b) city-pair space, lane-dense (2 vregs)
D_TRUE = 2        # coordinate dimension (2-D cities)
LANES = 128
MAX_GB = 64       # cap on genes evaluated per grid step


def _round_up(x, m):
    return ((x + m - 1) // m) * m


def _fitness_kernel(cities_ref, genes_ref, fit_ref, dist_ref):
    gb = genes_ref.shape[0]                      # genes in this block (static)

    # ---- distance metric in flat lane-dense (1, N*N) layout -----------------
    # dist_flat[0, a*N + b] = ||city_a - city_b||.  City coordinates are
    # selected with iota compare/select against SMEM scalars (no gathers,
    # no transposes, no MXU), so the math matches the f32 reference exactly.
    pair = lax.broadcasted_iota(jnp.int32, (1, NN), 1)
    a_idx = pair >> LOG2N                        # source city of the pair
    b_idx = pair & (N - 1)                       # destination city of the pair
    xa = jnp.zeros((1, NN), jnp.float32)
    ya = jnp.zeros((1, NN), jnp.float32)
    xb = jnp.zeros((1, NN), jnp.float32)
    yb = jnp.zeros((1, NN), jnp.float32)
    for k in range(N):                           # static unroll over cities
        xk = cities_ref[k, 0]                    # SMEM scalar reads
        yk = cities_ref[k, 1]
        is_a = a_idx == k
        is_b = b_idx == k
        xa = jnp.where(is_a, xk, xa)
        ya = jnp.where(is_a, yk, ya)
        xb = jnp.where(is_b, xk, xb)
        yb = jnp.where(is_b, yk, yb)
    dx = xa - xb
    dy = ya - yb
    dist_flat = jnp.sqrt(dx * dx + dy * dy)      # (1, NN) f32
    dist_ref[...] = dist_flat                    # disjoint block per step: no race

    # ---- batched closed-tour length over the gene block ---------------------
    g = genes_ref[...]                           # (gb, N) int32 permutations (VMEM)
    c_idx = lax.broadcasted_iota(jnp.int32, (gb, NN), 1)
    dist_b = jnp.broadcast_to(dist_flat, (gb, NN))
    acc = jnp.zeros((gb, NN), jnp.float32)
    for i in range(N):                           # static unroll over tour edges
        j = (i + 1) % N
        e = g[:, i:i + 1] * N + g[:, j:j + 1]    # (gb, 1) flat edge index
        acc = acc + jnp.where(c_idx == e, dist_b, 0.0)   # VPU-only, all genes at once
    fit = jnp.sum(acc, axis=1, keepdims=True)    # (gb, 1): ONE reduce per block
    fit_ref[...] = jnp.broadcast_to(fit, (gb, LANES))    # single unmasked block store


def fitness_forward(genes: jax.Array, cities: jax.Array):
    """genes: (G, N) int32 permutations of 0..N-1; cities: (N, 2) f32.
    Returns (fitness (G,) f32 closed-tour lengths, dist (N, N) f32 metric)."""
    genes = jnp.asarray(genes).astype(jnp.int32)
    cities = jnp.asarray(cities).astype(jnp.float32)
    g_true = genes.shape[0]

    # Block size: aim for exactly 2 grid steps (both TensorCores on v7x,
    # near-minimal step overhead on single-TC v5e/v6e), capped for huge
    # populations.  GB must be a multiple of 8 (sublane alignment).
    gb = min(_round_up(pl.cdiv(g_true, 2), 8), MAX_GB)
    g_pad = _round_up(g_true, gb)
    if g_pad != g_true:                          # pad population to a multiple of gb
        pad = jnp.broadcast_to(genes[:1], (g_pad - g_true, N))
        genes = jnp.concatenate([genes, pad], axis=0)
    nb = g_pad // gb

    fit_lanes, dist_rows = pl.pallas_call(
        _fitness_kernel,
        out_shape=(
            jax.ShapeDtypeStruct((g_pad, LANES), jnp.float32),
            jax.ShapeDtypeStruct((nb, 1, NN), jnp.float32),
        ),
        grid=(nb,),
        in_specs=[
            pl.BlockSpec(memory_space=pltpu.MemorySpace.SMEM),   # city table (scalars)
            pl.BlockSpec((gb, N), lambda b: (b, 0)),             # gene block (VMEM)
        ],
        out_specs=(
            pl.BlockSpec((gb, LANES), lambda b: (b, 0)),         # lane-dense fitness
            pl.BlockSpec((None, 1, NN), lambda b: (b, 0, 0)),    # per-step dist copy
        ),
        compiler_params=pltpu.CompilerParams(
            dimension_semantics=("parallel",)),
    )(cities, genes)

    dist = dist_rows[0, 0].reshape(N, N)
    return fit_lanes[:g_true, 0], dist


if __name__ == "__main__":
    key = jax.random.PRNGKey(0)
    k_city, k_perm = jax.random.split(key)

    G = 64  # GA population size
    cities = jax.random.normal(k_city, (N, D_TRUE), dtype=jnp.float32)
    gene_keys = jax.random.split(k_perm, G)
    genes = jnp.stack(
        [jax.random.permutation(k, N) for k in gene_keys]).astype(jnp.int32)

    fit, dist = fitness_forward(genes, cities)
    jax.block_until_ready((fit, dist))

    # plain-JAX reference check
    diff = cities[:, None, :] - cities[None, :, :]
    dist_ref = jnp.sqrt(jnp.sum(diff * diff, axis=-1))
    tour_ref = jnp.sum(dist_ref[genes, jnp.roll(genes, -1, axis=1)], axis=1)
    assert jnp.allclose(dist, dist_ref, atol=1e-5), "distance matrix mismatch"
    assert jnp.allclose(fit, tour_ref, atol=1e-4), "fitness mismatch"

    print("KERNEL_OK")
</pallas_src>

<mosaic_0001>
module attributes {stable_mosaic.version = 11 : i64} {
  func.func @_fitness_kernel(%arg0: i32, %arg1: memref<16x2xf32, #tpu.memory_space<smem>>, %arg2: memref<32x16xi32, #tpu.memory_space<vmem>>, %arg3: memref<32x128xf32, #tpu.memory_space<vmem>>, %arg4: memref<1x1x256xf32, #tpu.memory_space<vmem>>) attributes {dimension_semantics = [#tpu.dimension_semantics<parallel>], iteration_bounds = array<i64: 2>, scalar_prefetch = 0 : i64, scratch_operands = 0 : i64, tpu.core_type = #tpu.core_type<tc>, window_params = [{transform_indices = @transform_0, window_bounds = array<i64: 16, 2>}, {transform_indices = @transform_1, window_bounds = array<i64: 32, 16>}, {transform_indices = @transform_2, window_bounds = array<i64: 32, 128>}, {transform_indices = @transform_3, window_bounds = array<i64: 1, 1, 256>}]} {
    %0 = tpu.iota {dimensions = array<i32: 1>} : vector<1x256xi32>
    %c4_i32 = arith.constant 4 : i32
    %1 = vector.broadcast %c4_i32 : i32 to vector<1x256xi32>
    %2 = arith.shrsi %0, %1 : vector<1x256xi32>
    %c15_i32 = arith.constant 15 : i32
    %3 = vector.broadcast %c15_i32 : i32 to vector<1x256xi32>
    %4 = arith.andi %0, %3 : vector<1x256xi32>
    %cst = arith.constant 0.000000e+00 : f32
    %5 = vector.broadcast %cst : f32 to vector<1x256xf32>
    %cst_0 = arith.constant 0.000000e+00 : f32
    %6 = vector.broadcast %cst_0 : f32 to vector<1x256xf32>
    %cst_1 = arith.constant 0.000000e+00 : f32
    %7 = vector.broadcast %cst_1 : f32 to vector<1x256xf32>
    %cst_2 = arith.constant 0.000000e+00 : f32
    %8 = vector.broadcast %cst_2 : f32 to vector<1x256xf32>
    %c0 = arith.constant 0 : index
    %c0_3 = arith.constant 0 : index
    %9 = memref.load %arg1[%c0, %c0_3] : memref<16x2xf32, #tpu.memory_space<smem>>
    %c0_4 = arith.constant 0 : index
    %c1 = arith.constant 1 : index
    %10 = memref.load %arg1[%c0_4, %c1] : memref<16x2xf32, #tpu.memory_space<smem>>
    %c0_i32 = arith.constant 0 : i32
    %11 = vector.broadcast %c0_i32 : i32 to vector<1x256xi32>
    %12 = arith.cmpi eq, %2, %11 : vector<1x256xi32>
    %c0_i32_5 = arith.constant 0 : i32
    %13 = vector.broadcast %c0_i32_5 : i32 to vector<1x256xi32>
    %14 = arith.cmpi eq, %4, %13 : vector<1x256xi32>
    %15 = vector.broadcast %9 : f32 to vector<1x256xf32>
    %16 = arith.select %12, %15, %5 : vector<1x256xi1>, vector<1x256xf32>
    %17 = vector.broadcast %10 : f32 to vector<1x256xf32>
    %18 = arith.select %12, %17, %6 : vector<1x256xi1>, vector<1x256xf32>
    %19 = vector.broadcast %9 : f32 to vector<1x256xf32>
    %20 = arith.select %14, %19, %7 : vector<1x256xi1>, vector<1x256xf32>
    %21 = vector.broadcast %10 : f32 to vector<1x256xf32>
    %22 = arith.select %14, %21, %8 : vector<1x256xi1>, vector<1x256xf32>
    %c1_6 = arith.constant 1 : index
    %c0_7 = arith.constant 0 : index
    %23 = memref.load %arg1[%c1_6, %c0_7] : memref<16x2xf32, #tpu.memory_space<smem>>
    %c1_8 = arith.constant 1 : index
    %c1_9 = arith.constant 1 : index
    %24 = memref.load %arg1[%c1_8, %c1_9] : memref<16x2xf32, #tpu.memory_space<smem>>
    %c1_i32 = arith.constant 1 : i32
    %25 = vector.broadcast %c1_i32 : i32 to vector<1x256xi32>
    %26 = arith.cmpi eq, %2, %25 : vector<1x256xi32>
    %c1_i32_10 = arith.constant 1 : i32
    %27 = vector.broadcast %c1_i32_10 : i32 to vector<1x256xi32>
    %28 = arith.cmpi eq, %4, %27 : vector<1x256xi32>
    %29 = vector.broadcast %23 : f32 to vector<1x256xf32>
    %30 = arith.select %26, %29, %16 : vector<1x256xi1>, vector<1x256xf32>
    %31 = vector.broadcast %24 : f32 to vector<1x256xf32>
    %32 = arith.select %26, %31, %18 : vector<1x256xi1>, vector<1x256xf32>
    %33 = vector.broadcast %23 : f32 to vector<1x256xf32>
    %34 = arith.select %28, %33, %20 : vector<1x256xi1>, vector<1x256xf32>
    %35 = vector.broadcast %24 : f32 to vector<1x256xf32>
    %36 = arith.select %28, %35, %22 : vector<1x256xi1>, vector<1x256xf32>
    %c2 = arith.constant 2 : index
    %c0_11 = arith.constant 0 : index
    %37 = memref.load %arg1[%c2, %c0_11] : memref<16x2xf32, #tpu.memory_space<smem>>
    %c2_12 = arith.constant 2 : index
    %c1_13 = arith.constant 1 : index
    %38 = memref.load %arg1[%c2_12, %c1_13] : memref<16x2xf32, #tpu.memory_space<smem>>
    %c2_i32 = arith.constant 2 : i32
    %39 = vector.broadcast %c2_i32 : i32 to vector<1x256xi32>
    %40 = arith.cmpi eq, %2, %39 : vector<1x256xi32>
    %c2_i32_14 = arith.constant 2 : i32
    %41 = vector.broadcast %c2_i32_14 : i32 to vector<1x256xi32>
    %42 = arith.cmpi eq, %4, %41 : vector<1x256xi32>
    %43 = vector.broadcast %37 : f32 to vector<1x256xf32>
    %44 = arith.select %40, %43, %30 : vector<1x256xi1>, vector<1x256xf32>
    %45 = vector.broadcast %38 : f32 to vector<1x256xf32>
    %46 = arith.select %40, %45, %32 : vector<1x256xi1>, vector<1x256xf32>
    %47 = vector.broadcast %37 : f32 to vector<1x256xf32>
    %48 = arith.select %42, %47, %34 : vector<1x256xi1>, vector<1x256xf32>
    %49 = vector.broadcast %38 : f32 to vector<1x256xf32>
    %50 = arith.select %42, %49, %36 : vector<1x256xi1>, vector<1x256xf32>
    %c3 = arith.constant 3 : index
    %c0_15 = arith.constant 0 : index
    %51 = memref.load %arg1[%c3, %c0_15] : memref<16x2xf32, #tpu.memory_space<smem>>
    %c3_16 = arith.constant 3 : index
    %c1_17 = arith.constant 1 : index
    %52 = memref.load %arg1[%c3_16, %c1_17] : memref<16x2xf32, #tpu.memory_space<smem>>
    %c3_i32 = arith.constant 3 : i32
    %53 = vector.broadcast %c3_i32 : i32 to vector<1x256xi32>
    %54 = arith.cmpi eq, %2, %53 : vector<1x256xi32>
    %c3_i32_18 = arith.constant 3 : i32
    %55 = vector.broadcast %c3_i32_18 : i32 to vector<1x256xi32>
    %56 = arith.cmpi eq, %4, %55 : vector<1x256xi32>
    %57 = vector.broadcast %51 : f32 to vector<1x256xf32>
    %58 = arith.select %54, %57, %44 : vector<1x256xi1>, vector<1x256xf32>
    %59 = vector.broadcast %52 : f32 to vector<1x256xf32>
    %60 = arith.select %54, %59, %46 : vector<1x256xi1>, vector<1x256xf32>
    %61 = vector.broadcast %51 : f32 to vector<1x256xf32>
    %62 = arith.select %56, %61, %48 : vector<1x256xi1>, vector<1x256xf32>
    %63 = vector.broadcast %52 : f32 to vector<1x256xf32>
    %64 = arith.select %56, %63, %50 : vector<1x256xi1>, vector<1x256xf32>
    %c4 = arith.constant 4 : index
    %c0_19 = arith.constant 0 : index
    %65 = memref.load %arg1[%c4, %c0_19] : memref<16x2xf32, #tpu.memory_space<smem>>
    %c4_20 = arith.constant 4 : index
    %c1_21 = arith.constant 1 : index
    %66 = memref.load %arg1[%c4_20, %c1_21] : memref<16x2xf32, #tpu.memory_space<smem>>
    %c4_i32_22 = arith.constant 4 : i32
    %67 = vector.broadcast %c4_i32_22 : i32 to vector<1x256xi32>
    %68 = arith.cmpi eq, %2, %67 : vector<1x256xi32>
    %c4_i32_23 = arith.constant 4 : i32
    %69 = vector.broadcast %c4_i32_23 : i32 to vector<1x256xi32>
    %70 = arith.cmpi eq, %4, %69 : vector<1x256xi32>
    %71 = vector.broadcast %65 : f32 to vector<1x256xf32>
    %72 = arith.select %68, %71, %58 : vector<1x256xi1>, vector<1x256xf32>
    %73 = vector.broadcast %66 : f32 to vector<1x256xf32>
    %74 = arith.select %68, %73, %60 : vector<1x256xi1>, vector<1x256xf32>
    %75 = vector.broadcast %65 : f32 to vector<1x256xf32>
    %76 = arith.select %70, %75, %62 : vector<1x256xi1>, vector<1x256xf32>
    %77 = vector.broadcast %66 : f32 to vector<1x256xf32>
    %78 = arith.select %70, %77, %64 : vector<1x256xi1>, vector<1x256xf32>
    %c5 = arith.constant 5 : index
    %c0_24 = arith.constant 0 : index
    %79 = memref.load %arg1[%c5, %c0_24] : memref<16x2xf32, #tpu.memory_space<smem>>
    %c5_25 = arith.constant 5 : index
    %c1_26 = arith.constant 1 : index
    %80 = memref.load %arg1[%c5_25, %c1_26] : memref<16x2xf32, #tpu.memory_space<smem>>
    %c5_i32 = arith.constant 5 : i32
    %81 = vector.broadcast %c5_i32 : i32 to vector<1x256xi32>
    %82 = arith.cmpi eq, %2, %81 : vector<1x256xi32>
    %c5_i32_27 = arith.constant 5 : i32
    %83 = vector.broadcast %c5_i32_27 : i32 to vector<1x256xi32>
    %84 = arith.cmpi eq, %4, %83 : vector<1x256xi32>
    %85 = vector.broadcast %79 : f32 to vector<1x256xf32>
    %86 = arith.select %82, %85, %72 : vector<1x256xi1>, vector<1x256xf32>
    %87 = vector.broadcast %80 : f32 to vector<1x256xf32>
    %88 = arith.select %82, %87, %74 : vector<1x256xi1>, vector<1x256xf32>
    %89 = vector.broadcast %79 : f32 to vector<1x256xf32>
    %90 = arith.select %84, %89, %76 : vector<1x256xi1>, vector<1x256xf32>
    %91 = vector.broadcast %80 : f32 to vector<1x256xf32>
    %92 = arith.select %84, %91, %78 : vector<1x256xi1>, vector<1x256xf32>
    %c6 = arith.constant 6 : index
    %c0_28 = arith.constant 0 : index
    %93 = memref.load %arg1[%c6, %c0_28] : memref<16x2xf32, #tpu.memory_space<smem>>
    %c6_29 = arith.constant 6 : index
    %c1_30 = arith.constant 1 : index
    %94 = memref.load %arg1[%c6_29, %c1_30] : memref<16x2xf32, #tpu.memory_space<smem>>
    %c6_i32 = arith.constant 6 : i32
    %95 = vector.broadcast %c6_i32 : i32 to vector<1x256xi32>
    %96 = arith.cmpi eq, %2, %95 : vector<1x256xi32>
    %c6_i32_31 = arith.constant 6 : i32
    %97 = vector.broadcast %c6_i32_31 : i32 to vector<1x256xi32>
    %98 = arith.cmpi eq, %4, %97 : vector<1x256xi32>
    %99 = vector.broadcast %93 : f32 to vector<1x256xf32>
    %100 = arith.select %96, %99, %86 : vector<1x256xi1>, vector<1x256xf32>
    %101 = vector.broadcast %94 : f32 to vector<1x256xf32>
    %102 = arith.select %96, %101, %88 : vector<1x256xi1>, vector<1x256xf32>
    %103 = vector.broadcast %93 : f32 to vector<1x256xf32>
    %104 = arith.select %98, %103, %90 : vector<1x256xi1>, vector<1x256xf32>
    %105 = vector.broadcast %94 : f32 to vector<1x256xf32>
    %106 = arith.select %98, %105, %92 : vector<1x256xi1>, vector<1x256xf32>
    %c7 = arith.constant 7 : index
    %c0_32 = arith.constant 0 : index
    %107 = memref.load %arg1[%c7, %c0_32] : memref<16x2xf32, #tpu.memory_space<smem>>
    %c7_33 = arith.constant 7 : index
    %c1_34 = arith.constant 1 : index
    %108 = memref.load %arg1[%c7_33, %c1_34] : memref<16x2xf32, #tpu.memory_space<smem>>
    %c7_i32 = arith.constant 7 : i32
    %109 = vector.broadcast %c7_i32 : i32 to vector<1x256xi32>
    %110 = arith.cmpi eq, %2, %109 : vector<1x256xi32>
    %c7_i32_35 = arith.constant 7 : i32
    %111 = vector.broadcast %c7_i32_35 : i32 to vector<1x256xi32>
    %112 = arith.cmpi eq, %4, %111 : vector<1x256xi32>
    %113 = vector.broadcast %107 : f32 to vector<1x256xf32>
    %114 = arith.select %110, %113, %100 : vector<1x256xi1>, vector<1x256xf32>
    %115 = vector.broadcast %108 : f32 to vector<1x256xf32>
    %116 = arith.select %110, %115, %102 : vector<1x256xi1>, vector<1x256xf32>
    %117 = vector.broadcast %107 : f32 to vector<1x256xf32>
    %118 = arith.select %112, %117, %104 : vector<1x256xi1>, vector<1x256xf32>
    %119 = vector.broadcast %108 : f32 to vector<1x256xf32>
    %120 = arith.select %112, %119, %106 : vector<1x256xi1>, vector<1x256xf32>
    %c8 = arith.constant 8 : index
    %c0_36 = arith.constant 0 : index
    %121 = memref.load %arg1[%c8, %c0_36] : memref<16x2xf32, #tpu.memory_space<smem>>
    %c8_37 = arith.constant 8 : index
    %c1_38 = arith.constant 1 : index
    %122 = memref.load %arg1[%c8_37, %c1_38] : memref<16x2xf32, #tpu.memory_space<smem>>
    %c8_i32 = arith.constant 8 : i32
    %123 = vector.broadcast %c8_i32 : i32 to vector<1x256xi32>
    %124 = arith.cmpi eq, %2, %123 : vector<1x256xi32>
    %c8_i32_39 = arith.constant 8 : i32
    %125 = vector.broadcast %c8_i32_39 : i32 to vector<1x256xi32>
    %126 = arith.cmpi eq, %4, %125 : vector<1x256xi32>
    %127 = vector.broadcast %121 : f32 to vector<1x256xf32>
    %128 = arith.select %124, %127, %114 : vector<1x256xi1>, vector<1x256xf32>
    %129 = vector.broadcast %122 : f32 to vector<1x256xf32>
    %130 = arith.select %124, %129, %116 : vector<1x256xi1>, vector<1x256xf32>
    %131 = vector.broadcast %121 : f32 to vector<1x256xf32>
    %132 = arith.select %126, %131, %118 : vector<1x256xi1>, vector<1x256xf32>
    %133 = vector.broadcast %122 : f32 to vector<1x256xf32>
    %134 = arith.select %126, %133, %120 : vector<1x256xi1>, vector<1x256xf32>
    %c9 = arith.constant 9 : index
    %c0_40 = arith.constant 0 : index
    %135 = memref.load %arg1[%c9, %c0_40] : memref<16x2xf32, #tpu.memory_space<smem>>
    %c9_41 = arith.constant 9 : index
    %c1_42 = arith.constant 1 : index
    %136 = memref.load %arg1[%c9_41, %c1_42] : memref<16x2xf32, #tpu.memory_space<smem>>
    %c9_i32 = arith.constant 9 : i32
    %137 = vector.broadcast %c9_i32 : i32 to vector<1x256xi32>
    %138 = arith.cmpi eq, %2, %137 : vector<1x256xi32>
    %c9_i32_43 = arith.constant 9 : i32
    %139 = vector.broadcast %c9_i32_43 : i32 to vector<1x256xi32>
    %140 = arith.cmpi eq, %4, %139 : vector<1x256xi32>
    %141 = vector.broadcast %135 : f32 to vector<1x256xf32>
    %142 = arith.select %138, %141, %128 : vector<1x256xi1>, vector<1x256xf32>
    %143 = vector.broadcast %136 : f32 to vector<1x256xf32>
    %144 = arith.select %138, %143, %130 : vector<1x256xi1>, vector<1x256xf32>
    %145 = vector.broadcast %135 : f32 to vector<1x256xf32>
    %146 = arith.select %140, %145, %132 : vector<1x256xi1>, vector<1x256xf32>
    %147 = vector.broadcast %136 : f32 to vector<1x256xf32>
    %148 = arith.select %140, %147, %134 : vector<1x256xi1>, vector<1x256xf32>
    %c10 = arith.constant 10 : index
    %c0_44 = arith.constant 0 : index
    %149 = memref.load %arg1[%c10, %c0_44] : memref<16x2xf32, #tpu.memory_space<smem>>
    %c10_45 = arith.constant 10 : index
    %c1_46 = arith.constant 1 : index
    %150 = memref.load %arg1[%c10_45, %c1_46] : memref<16x2xf32, #tpu.memory_space<smem>>
    %c10_i32 = arith.constant 10 : i32
    %151 = vector.broadcast %c10_i32 : i32 to vector<1x256xi32>
    %152 = arith.cmpi eq, %2, %151 : vector<1x256xi32>
    %c10_i32_47 = arith.constant 10 : i32
    %153 = vector.broadcast %c10_i32_47 : i32 to vector<1x256xi32>
    %154 = arith.cmpi eq, %4, %153 : vector<1x256xi32>
    %155 = vector.broadcast %149 : f32 to vector<1x256xf32>
    %156 = arith.select %152, %155, %142 : vector<1x256xi1>, vector<1x256xf32>
    %157 = vector.broadcast %150 : f32 to vector<1x256xf32>
    %158 = arith.select %152, %157, %144 : vector<1x256xi1>, vector<1x256xf32>
    %159 = vector.broadcast %149 : f32 to vector<1x256xf32>
    %160 = arith.select %154, %159, %146 : vector<1x256xi1>, vector<1x256xf32>
    %161 = vector.broadcast %150 : f32 to vector<1x256xf32>
    %162 = arith.select %154, %161, %148 : vector<1x256xi1>, vector<1x256xf32>
    %c11 = arith.constant 11 : index
    %c0_48 = arith.constant 0 : index
    %163 = memref.load %arg1[%c11, %c0_48] : memref<16x2xf32, #tpu.memory_space<smem>>
    %c11_49 = arith.constant 11 : index
    %c1_50 = arith.constant 1 : index
    %164 = memref.load %arg1[%c11_49, %c1_50] : memref<16x2xf32, #tpu.memory_space<smem>>
    %c11_i32 = arith.constant 11 : i32
    %165 = vector.broadcast %c11_i32 : i32 to vector<1x256xi32>
    %166 = arith.cmpi eq, %2, %165 : vector<1x256xi32>
    %c11_i32_51 = arith.constant 11 : i32
    %167 = vector.broadcast %c11_i32_51 : i32 to vector<1x256xi32>
    %168 = arith.cmpi eq, %4, %167 : vector<1x256xi32>
    %169 = vector.broadcast %163 : f32 to vector<1x256xf32>
    %170 = arith.select %166, %169, %156 : vector<1x256xi1>, vector<1x256xf32>
    %171 = vector.broadcast %164 : f32 to vector<1x256xf32>
    %172 = arith.select %166, %171, %158 : vector<1x256xi1>, vector<1x256xf32>
    %173 = vector.broadcast %163 : f32 to vector<1x256xf32>
    %174 = arith.select %168, %173, %160 : vector<1x256xi1>, vector<1x256xf32>
    %175 = vector.broadcast %164 : f32 to vector<1x256xf32>
    %176 = arith.select %168, %175, %162 : vector<1x256xi1>, vector<1x256xf32>
    %c12 = arith.constant 12 : index
    %c0_52 = arith.constant 0 : index
    %177 = memref.load %arg1[%c12, %c0_52] : memref<16x2xf32, #tpu.memory_space<smem>>
    %c12_53 = arith.constant 12 : index
    %c1_54 = arith.constant 1 : index
    %178 = memref.load %arg1[%c12_53, %c1_54] : memref<16x2xf32, #tpu.memory_space<smem>>
    %c12_i32 = arith.constant 12 : i32
    %179 = vector.broadcast %c12_i32 : i32 to vector<1x256xi32>
    %180 = arith.cmpi eq, %2, %179 : vector<1x256xi32>
    %c12_i32_55 = arith.constant 12 : i32
    %181 = vector.broadcast %c12_i32_55 : i32 to vector<1x256xi32>
    %182 = arith.cmpi eq, %4, %181 : vector<1x256xi32>
    %183 = vector.broadcast %177 : f32 to vector<1x256xf32>
    %184 = arith.select %180, %183, %170 : vector<1x256xi1>, vector<1x256xf32>
    %185 = vector.broadcast %178 : f32 to vector<1x256xf32>
    %186 = arith.select %180, %185, %172 : vector<1x256xi1>, vector<1x256xf32>
    %187 = vector.broadcast %177 : f32 to vector<1x256xf32>
    %188 = arith.select %182, %187, %174 : vector<1x256xi1>, vector<1x256xf32>
    %189 = vector.broadcast %178 : f32 to vector<1x256xf32>
    %190 = arith.select %182, %189, %176 : vector<1x256xi1>, vector<1x256xf32>
    %c13 = arith.constant 13 : index
    %c0_56 = arith.constant 0 : index
    %191 = memref.load %arg1[%c13, %c0_56] : memref<16x2xf32, #tpu.memory_space<smem>>
    %c13_57 = arith.constant 13 : index
    %c1_58 = arith.constant 1 : index
    %192 = memref.load %arg1[%c13_57, %c1_58] : memref<16x2xf32, #tpu.memory_space<smem>>
    %c13_i32 = arith.constant 13 : i32
    %193 = vector.broadcast %c13_i32 : i32 to vector<1x256xi32>
    %194 = arith.cmpi eq, %2, %193 : vector<1x256xi32>
    %c13_i32_59 = arith.constant 13 : i32
    %195 = vector.broadcast %c13_i32_59 : i32 to vector<1x256xi32>
    %196 = arith.cmpi eq, %4, %195 : vector<1x256xi32>
    %197 = vector.broadcast %191 : f32 to vector<1x256xf32>
    %198 = arith.select %194, %197, %184 : vector<1x256xi1>, vector<1x256xf32>
    %199 = vector.broadcast %192 : f32 to vector<1x256xf32>
    %200 = arith.select %194, %199, %186 : vector<1x256xi1>, vector<1x256xf32>
    %201 = vector.broadcast %191 : f32 to vector<1x256xf32>
    %202 = arith.select %196, %201, %188 : vector<1x256xi1>, vector<1x256xf32>
    %203 = vector.broadcast %192 : f32 to vector<1x256xf32>
    %204 = arith.select %196, %203, %190 : vector<1x256xi1>, vector<1x256xf32>
    %c14 = arith.constant 14 : index
    %c0_60 = arith.constant 0 : index
    %205 = memref.load %arg1[%c14, %c0_60] : memref<16x2xf32, #tpu.memory_space<smem>>
    %c14_61 = arith.constant 14 : index
    %c1_62 = arith.constant 1 : index
    %206 = memref.load %arg1[%c14_61, %c1_62] : memref<16x2xf32, #tpu.memory_space<smem>>
    %c14_i32 = arith.constant 14 : i32
    %207 = vector.broadcast %c14_i32 : i32 to vector<1x256xi32>
    %208 = arith.cmpi eq, %2, %207 : vector<1x256xi32>
    %c14_i32_63 = arith.constant 14 : i32
    %209 = vector.broadcast %c14_i32_63 : i32 to vector<1x256xi32>
    %210 = arith.cmpi eq, %4, %209 : vector<1x256xi32>
    %211 = vector.broadcast %205 : f32 to vector<1x256xf32>
    %212 = arith.select %208, %211, %198 : vector<1x256xi1>, vector<1x256xf32>
    %213 = vector.broadcast %206 : f32 to vector<1x256xf32>
    %214 = arith.select %208, %213, %200 : vector<1x256xi1>, vector<1x256xf32>
    %215 = vector.broadcast %205 : f32 to vector<1x256xf32>
    %216 = arith.select %210, %215, %202 : vector<1x256xi1>, vector<1x256xf32>
    %217 = vector.broadcast %206 : f32 to vector<1x256xf32>
    %218 = arith.select %210, %217, %204 : vector<1x256xi1>, vector<1x256xf32>
    %c15 = arith.constant 15 : index
    %c0_64 = arith.constant 0 : index
    %219 = memref.load %arg1[%c15, %c0_64] : memref<16x2xf32, #tpu.memory_space<smem>>
    %c15_65 = arith.constant 15 : index
    %c1_66 = arith.constant 1 : index
    %220 = memref.load %arg1[%c15_65, %c1_66] : memref<16x2xf32, #tpu.memory_space<smem>>
    %c15_i32_67 = arith.constant 15 : i32
    %221 = vector.broadcast %c15_i32_67 : i32 to vector<1x256xi32>
    %222 = arith.cmpi eq, %2, %221 : vector<1x256xi32>
    %c15_i32_68 = arith.constant 15 : i32
    %223 = vector.broadcast %c15_i32_68 : i32 to vector<1x256xi32>
    %224 = arith.cmpi eq, %4, %223 : vector<1x256xi32>
    %225 = vector.broadcast %219 : f32 to vector<1x256xf32>
    %226 = arith.select %222, %225, %212 : vector<1x256xi1>, vector<1x256xf32>
    %227 = vector.broadcast %220 : f32 to vector<1x256xf32>
    %228 = arith.select %222, %227, %214 : vector<1x256xi1>, vector<1x256xf32>
    %229 = vector.broadcast %219 : f32 to vector<1x256xf32>
    %230 = arith.select %224, %229, %216 : vector<1x256xi1>, vector<1x256xf32>
    %231 = vector.broadcast %220 : f32 to vector<1x256xf32>
    %232 = arith.select %224, %231, %218 : vector<1x256xi1>, vector<1x256xf32>
    %233 = arith.subf %226, %230 : vector<1x256xf32>
    %234 = arith.subf %228, %232 : vector<1x256xf32>
    %235 = arith.mulf %233, %233 : vector<1x256xf32>
    %236 = arith.mulf %234, %234 : vector<1x256xf32>
    %237 = arith.addf %235, %236 : vector<1x256xf32>
    %238 = math.sqrt %237 : vector<1x256xf32>
    %c0_69 = arith.constant 0 : index
    %c0_70 = arith.constant 0 : index
    %c0_71 = arith.constant 0 : index
    %239 = vector.load %arg4[%c0_69, %c0_70, %c0_71] : memref<1x1x256xf32, #tpu.memory_space<vmem>>, vector<1x1x256xf32>
    %240 = vector.shape_cast %239 : vector<1x1x256xf32> to vector<1x256xf32>
    %241 = vector.shape_cast %238 : vector<1x256xf32> to vector<1x1x256xf32>
    tpu.vector_store %arg4[%c0_69, %c0_70, %c0_71], %241 {strides = array<i32>} : memref<1x1x256xf32, #tpu.memory_space<vmem>>, vector<1x1x256xf32>,
    %c0_72 = arith.constant 0 : index
    %c0_73 = arith.constant 0 : index
    %242 = vector.load %arg2[%c0_72, %c0_73] : memref<32x16xi32, #tpu.memory_space<vmem>>, vector<32x16xi32>
    %243 = tpu.iota {dimensions = array<i32: 1>} : vector<32x256xi32>
    %244 = vector.shape_cast %238 : vector<1x256xf32> to vector<1x256xf32>
    %245 = vector.broadcast %244 : vector<1x256xf32> to vector<32x256xf32>
    %cst_74 = arith.constant 0.000000e+00 : f32
    %246 = vector.broadcast %cst_74 : f32 to vector<32x256xf32>
    %247 = vector.extract_strided_slice %242 {offsets = [0, 0], sizes = [32, 1], strides = [1, 1]} : vector<32x16xi32> to vector<32x1xi32>
    %c16_i32 = arith.constant 16 : i32
    %248 = vector.broadcast %c16_i32 : i32 to vector<32x1xi32>
    %249 = arith.muli %247, %248 : vector<32x1xi32>
    %250 = vector.extract_strided_slice %242 {offsets = [0, 1], sizes = [32, 1], strides = [1, 1]} : vector<32x16xi32> to vector<32x1xi32>
    %251 = arith.addi %249, %250 : vector<32x1xi32>
    %252 = vector.broadcast %251 : vector<32x1xi32> to vector<32x256xi32>
    %253 = arith.cmpi eq, %243, %252 : vector<32x256xi32>
    %cst_75 = arith.constant 0.000000e+00 : f32
    %254 = vector.broadcast %cst_75 : f32 to vector<32x256xf32>
    %255 = arith.select %253, %245, %254 : vector<32x256xi1>, vector<32x256xf32>
    %256 = arith.addf %246, %255 : vector<32x256xf32>
    %257 = vector.extract_strided_slice %242 {offsets = [0, 1], sizes = [32, 1], strides = [1, 1]} : vector<32x16xi32> to vector<32x1xi32>
    %c16_i32_76 = arith.constant 16 : i32
    %258 = vector.broadcast %c16_i32_76 : i32 to vector<32x1xi32>
    %259 = arith.muli %257, %258 : vector<32x1xi32>
    %260 = vector.extract_strided_slice %242 {offsets = [0, 2], sizes = [32, 1], strides = [1, 1]} : vector<32x16xi32> to vector<32x1xi32>
    %261 = arith.addi %259, %260 : vector<32x1xi32>
    %262 = vector.broadcast %261 : vector<32x1xi32> to vector<32x256xi32>
    %263 = arith.cmpi eq, %243, %262 : vector<32x256xi32>
    %cst_77 = arith.constant 0.000000e+00 : f32
    %264 = vector.broadcast %cst_77 : f32 to vector<32x256xf32>
    %265 = arith.select %263, %245, %264 : vector<32x256xi1>, vector<32x256xf32>
    %266 = arith.addf %256, %265 : vector<32x256xf32>
    %267 = vector.extract_strided_slice %242 {offsets = [0, 2], sizes = [32, 1], strides = [1, 1]} : vector<32x16xi32> to vector<32x1xi32>
    %c16_i32_78 = arith.constant 16 : i32
    %268 = vector.broadcast %c16_i32_78 : i32 to vector<32x1xi32>
    %269 = arith.muli %267, %268 : vector<32x1xi32>
    %270 = vector.extract_strided_slice %242 {offsets = [0, 3], sizes = [32, 1], strides = [1, 1]} : vector<32x16xi32> to vector<32x1xi32>
    %271 = arith.addi %269, %270 : vector<32x1xi32>
    %272 = vector.broadcast %271 : vector<32x1xi32> to vector<32x256xi32>
    %273 = arith.cmpi eq, %243, %272 : vector<32x256xi32>
    %cst_79 = arith.constant 0.000000e+00 : f32
    %274 = vector.broadcast %cst_79 : f32 to vector<32x256xf32>
    %275 = arith.select %273, %245, %274 : vector<32x256xi1>, vector<32x256xf32>
    %276 = arith.addf %266, %275 : vector<32x256xf32>
    %277 = vector.extract_strided_slice %242 {offsets = [0, 3], sizes = [32, 1], strides = [1, 1]} : vector<32x16xi32> to vector<32x1xi32>
    %c16_i32_80 = arith.constant 16 : i32
    %278 = vector.broadcast %c16_i32_80 : i32 to vector<32x1xi32>
    %279 = arith.muli %277, %278 : vector<32x1xi32>
    %280 = vector.extract_strided_slice %242 {offsets = [0, 4], sizes = [32, 1], strides = [1, 1]} : vector<32x16xi32> to vector<32x1xi32>
    %281 = arith.addi %279, %280 : vector<32x1xi32>
    %282 = vector.broadcast %281 : vector<32x1xi32> to vector<32x256xi32>
    %283 = arith.cmpi eq, %243, %282 : vector<32x256xi32>
    %cst_81 = arith.constant 0.000000e+00 : f32
    %284 = vector.broadcast %cst_81 : f32 to vector<32x256xf32>
    %285 = arith.select %283, %245, %284 : vector<32x256xi1>, vector<32x256xf32>
    %286 = arith.addf %276, %285 : vector<32x256xf32>
    %287 = vector.extract_strided_slice %242 {offsets = [0, 4], sizes = [32, 1], strides = [1, 1]} : vector<32x16xi32> to vector<32x1xi32>
    %c16_i32_82 = arith.constant 16 : i32
    %288 = vector.broadcast %c16_i32_82 : i32 to vector<32x1xi32>
    %289 = arith.muli %287, %288 : vector<32x1xi32>
    %290 = vector.extract_strided_slice %242 {offsets = [0, 5], sizes = [32, 1], strides = [1, 1]} : vector<32x16xi32> to vector<32x1xi32>
    %291 = arith.addi %289, %290 : vector<32x1xi32>
    %292 = vector.broadcast %291 : vector<32x1xi32> to vector<32x256xi32>
    %293 = arith.cmpi eq, %243, %292 : vector<32x256xi32>
    %cst_83 = arith.constant 0.000000e+00 : f32
    %294 = vector.broadcast %cst_83 : f32 to vector<32x256xf32>
    %295 = arith.select %293, %245, %294 : vector<32x256xi1>, vector<32x256xf32>
    %296 = arith.addf %286, %295 : vector<32x256xf32>
    %297 = vector.extract_strided_slice %242 {offsets = [0, 5], sizes = [32, 1], strides = [1, 1]} : vector<32x16xi32> to vector<32x1xi32>
    %c16_i32_84 = arith.constant 16 : i32
    %298 = vector.broadcast %c16_i32_84 : i32 to vector<32x1xi32>
    %299 = arith.muli %297, %298 : vector<32x1xi32>
    %300 = vector.extract_strided_slice %242 {offsets = [0, 6], sizes = [32, 1], strides = [1, 1]} : vector<32x16xi32> to vector<32x1xi32>
    %301 = arith.addi %299, %300 : vector<32x1xi32>
    %302 = vector.broadcast %301 : vector<32x1xi32> to vector<32x256xi32>
    %303 = arith.cmpi eq, %243, %302 : vector<32x256xi32>
    %cst_85 = arith.constant 0.000000e+00 : f32
    %304 = vector.broadcast %cst_85 : f32 to vector<32x256xf32>
    %305 = arith.select %303, %245, %304 : vector<32x256xi1>, vector<32x256xf32>
    %306 = arith.addf %296, %305 : vector<32x256xf32>
    %307 = vector.extract_strided_slice %242 {offsets = [0, 6], sizes = [32, 1], strides = [1, 1]} : vector<32x16xi32> to vector<32x1xi32>
    %c16_i32_86 = arith.constant 16 : i32
    %308 = vector.broadcast %c16_i32_86 : i32 to vector<32x1xi32>
    %309 = arith.muli %307, %308 : vector<32x1xi32>
    %310 = vector.extract_strided_slice %242 {offsets = [0, 7], sizes = [32, 1], strides = [1, 1]} : vector<32x16xi32> to vector<32x1xi32>
    %311 = arith.addi %309, %310 : vector<32x1xi32>
    %312 = vector.broadcast %311 : vector<32x1xi32> to vector<32x256xi32>
    %313 = arith.cmpi eq, %243, %312 : vector<32x256xi32>
    %cst_87 = arith.constant 0.000000e+00 : f32
    %314 = vector.broadcast %cst_87 : f32 to vector<32x256xf32>
    %315 = arith.select %313, %245, %314 : vector<32x256xi1>, vector<32x256xf32>
    %316 = arith.addf %306, %315 : vector<32x256xf32>
    %317 = vector.extract_strided_slice %242 {offsets = [0, 7], sizes = [32, 1], strides = [1, 1]} : vector<32x16xi32> to vector<32x1xi32>
    %c16_i32_88 = arith.constant 16 : i32
    %318 = vector.broadcast %c16_i32_88 : i32 to vector<32x1xi32>
    %319 = arith.muli %317, %318 : vector<32x1xi32>
    %320 = vector.extract_strided_slice %242 {offsets = [0, 8], sizes = [32, 1], strides = [1, 1]} : vector<32x16xi32> to vector<32x1xi32>
    %321 = arith.addi %319, %320 : vector<32x1xi32>
    %322 = vector.broadcast %321 : vector<32x1xi32> to vector<32x256xi32>
    %323 = arith.cmpi eq, %243, %322 : vector<32x256xi32>
    %cst_89 = arith.constant 0.000000e+00 : f32
    %324 = vector.broadcast %cst_89 : f32 to vector<32x256xf32>
    %325 = arith.select %323, %245, %324 : vector<32x256xi1>, vector<32x256xf32>
    %326 = arith.addf %316, %325 : vector<32x256xf32>
    %327 = vector.extract_strided_slice %242 {offsets = [0, 8], sizes = [32, 1], strides = [1, 1]} : vector<32x16xi32> to vector<32x1xi32>
    %c16_i32_90 = arith.constant 16 : i32
    %328 = vector.broadcast %c16_i32_90 : i32 to vector<32x1xi32>
    %329 = arith.muli %327, %328 : vector<32x1xi32>
    %330 = vector.extract_strided_slice %242 {offsets = [0, 9], sizes = [32, 1], strides = [1, 1]} : vector<32x16xi32> to vector<32x1xi32>
    %331 = arith.addi %329, %330 : vector<32x1xi32>
    %332 = vector.broadcast %331 : vector<32x1xi32> to vector<32x256xi32>
    %333 = arith.cmpi eq, %243, %332 : vector<32x256xi32>
    %cst_91 = arith.constant 0.000000e+00 : f32
    %334 = vector.broadcast %cst_91 : f32 to vector<32x256xf32>
    %335 = arith.select %333, %245, %334 : vector<32x256xi1>, vector<32x256xf32>
    %336 = arith.addf %326, %335 : vector<32x256xf32>
    %337 = vector.extract_strided_slice %242 {offsets = [0, 9], sizes = [32, 1], strides = [1, 1]} : vector<32x16xi32> to vector<32x1xi32>
    %c16_i32_92 = arith.constant 16 : i32
    %338 = vector.broadcast %c16_i32_92 : i32 to vector<32x1xi32>
    %339 = arith.muli %337, %338 : vector<32x1xi32>
    %340 = vector.extract_strided_slice %242 {offsets = [0, 10], sizes = [32, 1], strides = [1, 1]} : vector<32x16xi32> to vector<32x1xi32>
    %341 = arith.addi %339, %340 : vector<32x1xi32>
    %342 = vector.broadcast %341 : vector<32x1xi32> to vector<32x256xi32>
    %343 = arith.cmpi eq, %243, %342 : vector<32x256xi32>
    %cst_93 = arith.constant 0.000000e+00 : f32
    %344 = vector.broadcast %cst_93 : f32 to vector<32x256xf32>
    %345 = arith.select %343, %245, %344 : vector<32x256xi1>, vector<32x256xf32>
    %346 = arith.addf %336, %345 : vector<32x256xf32>
    %347 = vector.extract_strided_slice %242 {offsets = [0, 10], sizes = [32, 1], strides = [1, 1]} : vector<32x16xi32> to vector<32x1xi32>
    %c16_i32_94 = arith.constant 16 : i32
    %348 = vector.broadcast %c16_i32_94 : i32 to vector<32x1xi32>
    %349 = arith.muli %347, %348 : vector<32x1xi32>
    %350 = vector.extract_strided_slice %242 {offsets = [0, 11], sizes = [32, 1], strides = [1, 1]} : vector<32x16xi32> to vector<32x1xi32>
    %351 = arith.addi %349, %350 : vector<32x1xi32>
    %352 = vector.broadcast %351 : vector<32x1xi32> to vector<32x256xi32>
    %353 = arith.cmpi eq, %243, %352 : vector<32x256xi32>
    %cst_95 = arith.constant 0.000000e+00 : f32
    %354 = vector.broadcast %cst_95 : f32 to vector<32x256xf32>
    %355 = arith.select %353, %245, %354 : vector<32x256xi1>, vector<32x256xf32>
    %356 = arith.addf %346, %355 : vector<32x256xf32>
    %357 = vector.extract_strided_slice %242 {offsets = [0, 11], sizes = [32, 1], strides = [1, 1]} : vector<32x16xi32> to vector<32x1xi32>
    %c16_i32_96 = arith.constant 16 : i32
    %358 = vector.broadcast %c16_i32_96 : i32 to vector<32x1xi32>
    %359 = arith.muli %357, %358 : vector<32x1xi32>
    %360 = vector.extract_strided_slice %242 {offsets = [0, 12], sizes = [32, 1], strides = [1, 1]} : vector<32x16xi32> to vector<32x1xi32>
    %361 = arith.addi %359, %360 : vector<32x1xi32>
    %362 = vector.broadcast %361 : vector<32x1xi32> to vector<32x256xi32>
    %363 = arith.cmpi eq, %243, %362 : vector<32x256xi32>
    %cst_97 = arith.constant 0.000000e+00 : f32
    %364 = vector.broadcast %cst_97 : f32 to vector<32x256xf32>
    %365 = arith.select %363, %245, %364 : vector<32x256xi1>, vector<32x256xf32>
    %366 = arith.addf %356, %365 : vector<32x256xf32>
    %367 = vector.extract_strided_slice %242 {offsets = [0, 12], sizes = [32, 1], strides = [1, 1]} : vector<32x16xi32> to vector<32x1xi32>
    %c16_i32_98 = arith.constant 16 : i32
    %368 = vector.broadcast %c16_i32_98 : i32 to vector<32x1xi32>
    %369 = arith.muli %367, %368 : vector<32x1xi32>
    %370 = vector.extract_strided_slice %242 {offsets = [0, 13], sizes = [32, 1], strides = [1, 1]} : vector<32x16xi32> to vector<32x1xi32>
    %371 = arith.addi %369, %370 : vector<32x1xi32>
    %372 = vector.broadcast %371 : vector<32x1xi32> to vector<32x256xi32>
    %373 = arith.cmpi eq, %243, %372 : vector<32x256xi32>
    %cst_99 = arith.constant 0.000000e+00 : f32
    %374 = vector.broadcast %cst_99 : f32 to vector<32x256xf32>
    %375 = arith.select %373, %245, %374 : vector<32x256xi1>, vector<32x256xf32>
    %376 = arith.addf %366, %375 : vector<32x256xf32>
    %377 = vector.extract_strided_slice %242 {offsets = [0, 13], sizes = [32, 1], strides = [1, 1]} : vector<32x16xi32> to vector<32x1xi32>
    %c16_i32_100 = arith.constant 16 : i32
    %378 = vector.broadcast %c16_i32_100 : i32 to vector<32x1xi32>
    %379 = arith.muli %377, %378 : vector<32x1xi32>
    %380 = vector.extract_strided_slice %242 {offsets = [0, 14], sizes = [32, 1], strides = [1, 1]} : vector<32x16xi32> to vector<32x1xi32>
    %381 = arith.addi %379, %380 : vector<32x1xi32>
    %382 = vector.broadcast %381 : vector<32x1xi32> to vector<32x256xi32>
    %383 = arith.cmpi eq, %243, %382 : vector<32x256xi32>
    %cst_101 = arith.constant 0.000000e+00 : f32
    %384 = vector.broadcast %cst_101 : f32 to vector<32x256xf32>
    %385 = arith.select %383, %245, %384 : vector<32x256xi1>, vector<32x256xf32>
    %386 = arith.addf %376, %385 : vector<32x256xf32>
    %387 = vector.extract_strided_slice %242 {offsets = [0, 14], sizes = [32, 1], strides = [1, 1]} : vector<32x16xi32> to vector<32x1xi32>
    %c16_i32_102 = arith.constant 16 : i32
    %388 = vector.broadcast %c16_i32_102 : i32 to vector<32x1xi32>
    %389 = arith.muli %387, %388 : vector<32x1xi32>
    %390 = vector.extract_strided_slice %242 {offsets = [0, 15], sizes = [32, 1], strides = [1, 1]} : vector<32x16xi32> to vector<32x1xi32>
    %391 = arith.addi %389, %390 : vector<32x1xi32>
    %392 = vector.broadcast %391 : vector<32x1xi32> to vector<32x256xi32>
    %393 = arith.cmpi eq, %243, %392 : vector<32x256xi32>
    %cst_103 = arith.constant 0.000000e+00 : f32
    %394 = vector.broadcast %cst_103 : f32 to vector<32x256xf32>
    %395 = arith.select %393, %245, %394 : vector<32x256xi1>, vector<32x256xf32>
    %396 = arith.addf %386, %395 : vector<32x256xf32>
    %397 = vector.extract_strided_slice %242 {offsets = [0, 15], sizes = [32, 1], strides = [1, 1]} : vector<32x16xi32> to vector<32x1xi32>
    %c16_i32_104 = arith.constant 16 : i32
    %398 = vector.broadcast %c16_i32_104 : i32 to vector<32x1xi32>
    %399 = arith.muli %397, %398 : vector<32x1xi32>
    %400 = vector.extract_strided_slice %242 {offsets = [0, 0], sizes = [32, 1], strides = [1, 1]} : vector<32x16xi32> to vector<32x1xi32>
    %401 = arith.addi %399, %400 : vector<32x1xi32>
    %402 = vector.broadcast %401 : vector<32x1xi32> to vector<32x256xi32>
    %403 = arith.cmpi eq, %243, %402 : vector<32x256xi32>
    %cst_105 = arith.constant 0.000000e+00 : f32
    %404 = vector.broadcast %cst_105 : f32 to vector<32x256xf32>
    %405 = arith.select %403, %245, %404 : vector<32x256xi1>, vector<32x256xf32>
    %406 = arith.addf %396, %405 : vector<32x256xf32>
    %cst_106 = arith.constant dense<0.000000e+00> : vector<32xf32>
    %407 = vector.multi_reduction <add>, %406, %cst_106 [1] : vector<32x256xf32> to vector<32xf32>
    %408 = vector.shape_cast %407 : vector<32xf32> to vector<32x1xf32>
    %409 = vector.shape_cast %408 : vector<32x1xf32> to vector<32x1xf32>
    %410 = vector.broadcast %409 : vector<32x1xf32> to vector<32x128xf32>
    %c0_107 = arith.constant 0 : index
    %c0_108 = arith.constant 0 : index
    %411 = vector.load %arg3[%c0_107, %c0_108] : memref<32x128xf32, #tpu.memory_space<vmem>>, vector<32x128xf32>
    tpu.vector_store %arg3[%c0_107, %c0_108], %410 {strides = array<i32>} : memref<32x128xf32, #tpu.memory_space<vmem>>, vector<32x128xf32>,
    return
  }
  func.func @transform_0(%arg0: i32) -> (i32, i32) {
    %c0_i32 = arith.constant 0 : i32
    %c0_i32_0 = arith.constant 0 : i32
    %c0_i32_1 = arith.constant 0 : i32
    return %c0_i32, %c0_i32_0 : i32, i32
  }
  func.func @transform_1(%arg0: i32) -> (i32, i32) {
    %c0_i32 = arith.constant 0 : i32
    %c0_i32_0 = arith.constant 0 : i32
    return %arg0, %c0_i32 : i32, i32
  }
  func.func @transform_2(%arg0: i32) -> (i32, i32) {
    %c0_i32 = arith.constant 0 : i32
    %c0_i32_0 = arith.constant 0 : i32
    return %arg0, %c0_i32 : i32, i32
  }
  func.func @transform_3(%arg0: i32) -> (i32, i32, i32) {
    %c0_i32 = arith.constant 0 : i32
    %c0_i32_0 = arith.constant 0 : i32
    %c0_i32_1 = arith.constant 0 : i32
    return %arg0, %c0_i32, %c0_i32_0 : i32, i32, i32
  }
}

</mosaic_0001>

<bundles_post_ra>
// kernel: tpu_custom_call.1
= control target key start
LH: loop header
LB: loop body
LE: loop exit
PB: predicated region body
PF: predicated region fallthrough
CT: control target
= control target key end

     0   :  { %9 = vsyncpa [#allocation4], 0  ;;  %s2481_s0 = inlined_call_operand.vmem [shape: f32[16,2], index: 0, kind: input, shape index: {}]   ;;  %s2482_s1 = inlined_call_operand.vmem [shape: s32[64,16], index: 1, kind: input, shape index: {}]   ;;  %s2483_s2 = inlined_call_operand.hbm [shape: f32[64,128], index: 2, kind: output, shape index: {0}]   ;;  %s2484_s3 = inlined_call_operand.hbm [shape: f32[2,1,256], index: 3, kind: output, shape index: {1}]  }
   0x1   :  { %10 = vsyncpa [#allocation3], 0 }
   0x2   :  { %12 = vsyncpa [#allocation3 + $0x1], 0 }
   0x3   :  { %13 = vsyncpa [#allocation7], 0 }
   0x4   :  { %15 = vsyncpa [#allocation7 + $0x1], 0  ;;  %s1609_s12 = smov 0   ;;  %s1611_s13 = smov 0  }
   0x5   :  { %s1613_s14 = smov 0   ;;  %s1615_s15 = smov 0  }
   0x6 LB: > { %s1630_s16 = sadd.s32 4294967295, %s1564_s15   ;;  %s1273_s17 = sadd.s32 4294967294, %s1564_s15   ;;  %s1564_s15 = sphi %s1615_s15, %s2490_s15   ;;  %s1560_s14 = sphi %s1613_s14, %s2489_s14   ;;  %s1556_s13 = sphi %s1611_s13, %s2488_s13   ;;  %s1552_s12 = sphi %s1609_s12, %s2487_s12  }
   0x7   : > { %s1634_s18 = sadd.s32 1, %s1564_s15   ;;  %s75_s19 = sadd.s32 1, %s1560_s14 }
   0x8   : > { %s72_s20 = ssub.s32 %s1564_s15, %s1634_s18  ;;  %p85_p0 = scmp.ne.s32.totalorder %s1560_s14, %s1556_s13 }
   0x9   : > { %p73_p1 = scmp.eq.s32.totalorder %s72_s20, 0  ;;  %p86_p2 = scmp.eq.s32.totalorder %s1630_s16, 1 }
   0xa   : > { %p91_p3 = scmp.ne.s32.totalorder %s1556_s13, %s1552_s12  ;;  %p92_p4 = scmp.eq.s32.totalorder %s1273_s17, 1 }
   0xb   : > { %s1645_s21 = scalar_select %p73_p1, %s1560_s14, %s75_s19  }
   0xc   : > { %p1647_p5 = por %p86_p2, %p85_p0  ;;  %p1651_p6 = por %p92_p4, %p91_p3 }
   0xd   : > { %p1274_p7 = scmp.ge.s32.totalorder %s1564_s15, 1  ;;  %p125_p8 = scmp.lt.s32.totalorder %s1564_s15, 3 }
   0xe   : > { %p1341_p9 = scmp.eq.s32.totalorder %s1630_s16, 0  ;;  %s136_s26 = sshll.u32 %s2481_s0, 4  ;;  %s137_s26 = int_to_ptr.vmem [resolvable:$true] %s136_s26 }
   0xf   : > { %p126_p10 = pnand %p1274_p7, %p125_p8  ;;  %s1566_s27 = smov [#allocation2]  }
  0x10   : > { %s1567_s28 = smov 128   ;;  %s1568_s29 = smov 8  }
  0x11   : > { %p1330_p11 = pneg %p126_p10  ;;  %161 = sbr.rel (%p126_p10) target bundleno = 688 (0x2b0), region = 28 }
  0x13   : > { %p1331_p12 = pnand %p1341_p9, %p1330_p11 }
  0x15   : > { %1333 = dma.vmem_to_smem (!%p1331_p12), %s137_s26, 256, %s1566_s27, [#allocation4], %s1567_s28, %s1567_s28, %s1568_s29  }
  0x16   : > { %1539 = dma.done.wait (%p1341_p9), [#allocation4], 256  }
  0x17   : > { %1541 = vsyncadd (%p1341_p9), [#allocation4], 4294967040 }
  0x18   : > { %168 = sfence }
  0x19   : > { %s1281_s30 = sshll.u32 %s1630_s16, 2  ;;  %s1569_s8 = smov 127   ;;  %v1570_v4 = vmov 0   ;;  %v1571_v17 = vmov 1   ;;  %v1572_v18 = vmov 3   ;;  %v199_v19 = vlaneseq }
  0x1a   : > { %p193_p13 = scmp.lt.s32.totalorder %s1281_s30, 7  ;;  %1400 = vset.pattern.permute.xlu0 %v1570_v4  ;;  %1399 = vset.pattern.permute.xlu2 %v1570_v4  ;;  %s206_s9 = sld [smem:[#allocation2]]  ;;  %v1573_v26 = vmov 2   ;;  %v1574_v27 = vmov 4   ;;  %v1575_v53 = vmov 5  }
  0x1b   : > { %1401 = vset.pattern.permute.xlu1 %v1570_v4  ;;  %s1283_s10 = sld [smem:[#allocation2 + $0x1]]  ;;  %v1713_v20 = vand.u32 127, %v199_v19 }
  0x1c   : > { %s2492_s30 = smov (!%p193_p13, %s1281_s30), 7  ;;  %s1718_s11 = sld [smem:[#allocation2 + $0x80]] }
  0x1d   : > { %s1282_s4 = sshll.u32 %s2492_s30, 3  ;;  %v1716_v21 = vadd.s32 128, %v1713_v20  ;;  %s1720_s17 = sld [smem:[#allocation2 + $0x81]]  ;;  %v1723_v22 = vshra.s32 %v1713_v20, 4  ;;  %v1729_v24 = vand.u32 15, %v1713_v20 }
  0x1e   : > { %s1665_s7 = scalar_lea.vmem %s2482_s1, %s1282_s4  ;;  %s1734_s19 = sld [smem:[#allocation2 + $0x100]] }
  0x1f   : > { %v1668_v0 = vld [vmem:[%s1665_s7 + $0x10] sm:$0xff]  ;;  %v1671_v1 = vld [vmem:[%s1665_s7] sm:$0xff]  ;;  %v1676_v2 = vld [vmem:[%s1665_s7 + $0x18] sm:$0xff]  ;;  %v1726_v23 = vshra.s32 %v1716_v21, 4  ;;  %v1732_v25 = vand.u32 15, %v1716_v21  ;;  %vm208_vm0 = vcmp.eq.s32.totalorder %v1723_v22, 0 }
  0x20   : > { %519 = vrot.lane.b32.xlu1 %v1668_v0, %s1569_s8  ;;  %515 = vrot.lane.b32.xlu0 %v1671_v1, %s1569_s8  ;;  %v1679_v3 = vld [vmem:[%s1665_s7 + $0x8] sm:$0xff]  ;;  %v513_v5 = vmul.u32 16, %v1668_v0  ;;  %v511_v6 = vmul.u32 16, %v1671_v1  ;;  %v514_v11 = vmul.u32 16, %v1676_v2  ;;  %vm210_vm2 = vcmp.eq.s32.totalorder %v1729_v24, 0  ;;  %s1741_s20 = sld [smem:[#allocation2 + $0x101]] }
  0x21   : > { %v512_v12 = vmul.u32 16, %v1679_v3  ;;  %vm209_vm1 = vcmp.eq.s32.totalorder %v1726_v23, 0  ;;  %vm211_vm3 = vcmp.eq.s32.totalorder %v1732_v25, 0  ;;  %v212_v28 = vstv %s206_s9  ;;  %s1754_s24 = sld [smem:[#allocation2 + $0x180]] }
  0x22   : > { %v215_v29 = vstv %s1283_s10  ;;  %vm224_vm4 = vcmp.eq.s32.totalorder %v1723_v22, 1  ;;  %vm225_vm5 = vcmp.eq.s32.totalorder %v1726_v23, 1  ;;  %v213_v30 = vsel %vm208_vm0, %v212_v28, 0.0  ;;  %s1761_s25 = sld [smem:[#allocation2 + $0x181]] }
  0x23   : > { %v214_v31 = vsel %vm209_vm1, %v212_v28, 0.0  ;;  %v216_v32 = vsel %vm208_vm0, %v215_v29, 0.0  ;;  %v217_v33 = vsel %vm209_vm1, %v215_v29, 0.0  ;;  %v218_v34 = vsel %vm210_vm2, %v212_v28, 0.0  ;;  %s1772_s26 = sld [smem:[#allocation2 + $0x200]] }
  0x24   : > { %v219_v35 = vsel %vm211_vm3, %v212_v28, 0.0  ;;  %v220_v36 = vsel %vm210_vm2, %v215_v29, 0.0  ;;  %v221_v37 = vsel %vm211_vm3, %v215_v29, 0.0  ;;  %vm226_vm6 = vcmp.eq.s32.totalorder %v1729_v24, 1  ;;  %s1777_s27 = sld [smem:[#allocation2 + $0x201]] }
  0x25   : > { %vm227_vm7 = vcmp.eq.s32.totalorder %v1732_v25, 1  ;;  %v228_v38 = vstv %s1718_s11  ;;  %v231_v41 = vstv %s1720_s17  ;;  %vm240_vm8 = vcmp.eq.s32.totalorder %v1723_v22, 2  ;;  %s1797_s28 = sld [smem:[#allocation2 + $0x280]] }
  0x26   : > { %v229_v39 = vsel %vm224_vm4, %v228_v38, %v213_v30  ;;  %v230_v40 = vsel %vm225_vm5, %v228_v38, %v214_v31  ;;  %v234_v42 = vsel %vm226_vm6, %v228_v38, %v218_v34  ;;  %v232_v43 = vsel %vm224_vm4, %v231_v41, %v216_v32  ;;  %s1805_s29 = sld [smem:[#allocation2 + $0x281]] }
  0x27   : > { %v233_v44 = vsel %vm225_vm5, %v231_v41, %v217_v33  ;;  %v235_v45 = vsel %vm227_vm7, %v228_v38, %v219_v35  ;;  %v236_v46 = vsel %vm226_vm6, %v231_v41, %v220_v36  ;;  %v237_v47 = vsel %vm227_vm7, %v231_v41, %v221_v37  ;;  %s1818_s30 = sld [smem:[#allocation2 + $0x300]] }
  0x28   : > { %521 = vrot.lane.b32.xlu1 %v1676_v2, %s1569_s8  ;;  %517 = vrot.lane.b32.xlu0 %v1679_v3, %s1569_s8  ;;  %vm241_vm9 = vcmp.eq.s32.totalorder %v1726_v23, 2  ;;  %vm242_vm10 = vcmp.eq.s32.totalorder %v1729_v24, 2  ;;  %vm243_vm11 = vcmp.eq.s32.totalorder %v1732_v25, 2  ;;  %v244_v48 = vstv %s1734_s19  ;;  %s1824_s4 = sld [smem:[#allocation2 + $0x301]] }
  0x29   : > { %v247_v49 = vstv %s1741_s20  ;;  %vm256_vm12 = vcmp.eq.s32.totalorder %v1723_v22, 3  ;;  %v245_v50 = vsel %vm240_vm8, %v244_v48, %v229_v39  ;;  %v246_v51 = vsel %vm241_vm9, %v244_v48, %v230_v40  ;;  %s1831_s5 = sld [smem:[#allocation2 + $0x380]] }
  0x2a   : > { %v248_v52 = vsel %vm240_vm8, %v247_v49, %v232_v43  ;;  %vm257_vm13 = vcmp.eq.s32.totalorder %v1726_v23, 3  ;;  %v249_v54 = vsel %vm241_vm9, %v247_v49, %v233_v44  ;;  %v250_v55 = vsel %vm242_vm10, %v244_v48, %v234_v42  ;;  %s1839_s6 = sld [smem:[#allocation2 + $0x381]] }
  0x2b   : > { %v251_v56 = vsel %vm243_vm11, %v244_v48, %v235_v45  ;;  %v252_v57 = vsel %vm242_vm10, %v247_v49, %v236_v46  ;;  %v253_v58 = vsel %vm243_vm11, %v247_v49, %v237_v47  ;;  %vm258_vm14 = vcmp.eq.s32.totalorder %v1729_v24, 3  ;;  %s1857_s8 = sld [smem:[#allocation2 + $0x400]] }
  0x2c   : > { %vm259_vm15 = vcmp.eq.s32.totalorder %v1732_v25, 3  ;;  %v260_v59 = vstv %s1754_s24  ;;  %v263_v62 = vstv %s1761_s25  ;;  %vm272_vm0 = vcmp.eq.s32.totalorder %v1723_v22, 4  ;;  %s1864_s9 = sld [smem:[#allocation2 + $0x401]] }
  0x2d   : > { %v261_v60 = vsel %vm256_vm12, %v260_v59, %v245_v50  ;;  %v262_v61 = vsel %vm257_vm13, %v260_v59, %v246_v51  ;;  %v264_v63 = vsel %vm256_vm12, %v263_v62, %v248_v52  ;;  %v265_v4 = vsel %vm257_vm13, %v263_v62, %v249_v54  ;;  %s1875_s10 = sld [smem:[#allocation2 + $0x480]] }
  0x2e   : > { %vm273_vm1 = vcmp.eq.s32.totalorder %v1726_v23, 4  ;;  %vm274_vm2 = vcmp.eq.s32.totalorder %v1729_v24, 4  ;;  %vm275_vm3 = vcmp.eq.s32.totalorder %v1732_v25, 4  ;;  %vm288_vm4 = vcmp.eq.s32.totalorder %v1723_v22, 5  ;;  %s1881_s11 = sld [smem:[#allocation2 + $0x481]] }
  0x2f   : > { %vm289_vm5 = vcmp.eq.s32.totalorder %v1726_v23, 5  ;;  %vm290_vm6 = vcmp.eq.s32.totalorder %v1729_v24, 5  ;;  %vm291_vm7 = vcmp.eq.s32.totalorder %v1732_v25, 5  ;;  %v1576_v36 = vmov 6   ;;  %s1894_s17 = sld [smem:[#allocation2 + $0x500]] }
  0x30   : > { %v292_v37 = vstv %s1797_s28  ;;  %v295_v38 = vstv %s1805_s29  ;;  %vm304_vm8 = vcmp.eq.s32.totalorder %v1723_v22, 6  ;;  %vm305_vm9 = vcmp.eq.s32.totalorder %v1726_v23, 6  ;;  %s1901_s19 = sld [smem:[#allocation2 + $0x501]] }
  0x31   : > { %vm306_vm10 = vcmp.eq.s32.totalorder %v1729_v24, 6  ;;  %vm307_vm11 = vcmp.eq.s32.totalorder %v1732_v25, 6  ;;  %v308_v47 = vstv %s1818_s30  ;;  %v311_v50 = vstv %s1824_s4  ;;  %s1908_s20 = sld [smem:[#allocation2 + $0x580]] }
  0x32   : > { %vm320_vm12 = vcmp.eq.s32.totalorder %v1723_v22, 7  ;;  %vm321_vm13 = vcmp.eq.s32.totalorder %v1726_v23, 7  ;;  %s1913_s24 = sld [smem:[#allocation2 + $0x581]] }
  0x33   : > { %s1929_s25 = sld [smem:[#allocation2 + $0x600]] }
  0x34   : > { %s1959_s28 = sld [smem:[#allocation2 + $0x681]] }
  0x35   : > { %s1965_s29 = sld [smem:[#allocation2 + $0x700]] }
  0x36   : > { %s1973_s30 = sld [smem:[#allocation2 + $0x701]] }
  0x37   : > { %s1981_s4 = sld [smem:[#allocation2 + $0x780]] }
  0x92   : > { %v520_v7 = vpop.permute.xlu1 %519  ;;  %v516_v8 = vpop.permute.xlu0 %515 }
  0x93   : > { %v1687_v9 = vadd.s32 %v520_v7, %v513_v5  ;;  %v1691_v10 = vadd.s32 %v516_v8, %v511_v6  ;;  %v266_v7 = vsel %vm258_vm14, %v260_v59, %v250_v55  ;;  %v267_v8 = vsel %vm259_vm15, %v260_v59, %v251_v56 }
  0x94   : > { %v327_v59 = vstv %s1839_s6  ;;  %s1581_s6 = smov 15  }
  0x95   : > { %534 = vperm.xlu0 %1400, %v1687_v9   ;;  %528 = vperm.xlu2 %1399, %v1691_v10  }
  0x9a   : > { %v522_v13 = vpop.permute.xlu1 %521  ;;  %v518_v14 = vpop.permute.xlu0 %517 }
  0x9b   : > { %v1699_v15 = vadd.s32 %v522_v13, %v514_v11  ;;  %v1703_v16 = vadd.s32 %v518_v14, %v512_v12  ;;  %v268_v13 = vsel %vm258_vm14, %v263_v62, %v252_v57  ;;  %v269_v14 = vsel %vm259_vm15, %v263_v62, %v253_v58 }
  0x9c   : > { %vm322_vm14 = vcmp.eq.s32.totalorder %v1729_v24, 7  ;;  %vm323_vm15 = vcmp.eq.s32.totalorder %v1732_v25, 7  ;;  %v324_v58 = vstv %s1831_s5  ;;  %s1987_s5 = sld [smem:[#allocation2 + $0x781]] }
  0x9d   : > { %537 = vperm.xlu1 %1401, %v1699_v15   ;;  %1404 = vset.pattern.permute.xlu0 %v1571_v17 }
  0x9e   : > { %531 = vperm.xlu2 %1399, %v1703_v16   ;;  %573 = vperm.xlu0 %1404, %v1699_v15  }
  0xa5   : > { %1403 = vset.pattern.permute.xlu1 %v1571_v17 }
  0xa6   : > { %1402 = vset.pattern.permute.xlu2 %v1571_v17  ;;  %1407 = vset.pattern.permute.xlu0 %v1572_v18  ;;  %v276_v17 = vstv %s1772_s26  ;;  %s1937_s26 = sld [smem:[#allocation2 + $0x601]] }
  0xa7   : > { %567 = vperm.xlu1 %1403, %v1703_v16   ;;  %564 = vperm.xlu2 %1402, %v1691_v10   ;;  %v277_v28 = vsel %vm272_vm0, %v276_v17, %v261_v60  ;;  %v278_v29 = vsel %vm273_vm1, %v276_v17, %v262_v61  ;;  %v282_v32 = vsel %vm274_vm2, %v276_v17, %v266_v7 }
  0xa8   : > { %636 = vperm.xlu0 %1407, %v1691_v10   ;;  %v283_v33 = vsel %vm275_vm3, %v276_v17, %v267_v8  ;;  %v293_v39 = vsel %vm288_vm4, %v292_v37, %v277_v28  ;;  %v294_v40 = vsel %vm289_vm5, %v292_v37, %v278_v29  ;;  %v298_v43 = vsel %vm290_vm6, %v292_v37, %v282_v32 }
  0xa9   : > { %v299_v44 = vsel %vm291_vm7, %v292_v37, %v283_v33  ;;  %v309_v48 = vsel %vm304_vm8, %v308_v47, %v293_v39  ;;  %v310_v49 = vsel %vm305_vm9, %v308_v47, %v294_v40  ;;  %v314_v51 = vsel %vm306_vm10, %v308_v47, %v298_v43 }
  0xaa   : > { %v315_v55 = vsel %vm307_vm11, %v308_v47, %v299_v44  ;;  %v326_v60 = vsel %vm321_vm13, %v324_v58, %v310_v49  ;;  %v343_v28 = vstv %s1864_s9  ;;  %v359_v37 = vstv %s1881_s11  ;;  %s1318_s11 = sshll.u32 %s1630_s16, 1 }
  0xab   : > { %v331_v7 = vsel %vm323_vm15, %v324_v58, %v315_v55  ;;  %v375_v49 = vstv %s1901_s19 }
  0xaf   : > { %1405 = vset.pattern.permute.xlu1 %v1573_v26  ;;  %570 = vperm.xlu2 %1402, %v1687_v9  }
  0xb0   : > { %1411 = vset.pattern.permute.xlu0 %v1574_v27  ;;  %600 = vperm.xlu1 %1405, %v1691_v10  }
  0xb1   : > { %675 = vperm.xlu0 %1411, %v1703_v16  }
  0xb7   : > { %1406 = vset.pattern.permute.xlu2 %v1573_v26  ;;  %v279_v26 = vstv %s1777_s27  ;;  %s1954_s27 = sld [smem:[#allocation2 + $0x680]] }
  0xb8   : > { %606 = vperm.xlu1 %1405, %v1687_v9   ;;  %603 = vperm.xlu2 %1406, %v1703_v16   ;;  %v280_v30 = vsel %vm272_vm0, %v279_v26, %v264_v63  ;;  %v281_v31 = vsel %vm273_vm1, %v279_v26, %v265_v4  ;;  %v284_v34 = vsel %vm274_vm2, %v279_v26, %v268_v13  ;;  %vm336_vm0 = vcmp.eq.s32.totalorder %v1723_v22, 8 }
  0xb9   : > { %1415 = vset.pattern.permute.xlu0 %v1575_v53  ;;  %v285_v35 = vsel %vm275_vm3, %v279_v26, %v269_v14  ;;  %v296_v41 = vsel %vm288_vm4, %v295_v38, %v280_v30  ;;  %v297_v42 = vsel %vm289_vm5, %v295_v38, %v281_v31  ;;  %v300_v45 = vsel %vm290_vm6, %v295_v38, %v284_v34 }
  0xba   : > { %714 = vperm.xlu0 %1415, %v1687_v9   ;;  %v301_v46 = vsel %vm291_vm7, %v295_v38, %v285_v35  ;;  %v312_v52 = vsel %vm304_vm8, %v311_v50, %v296_v41  ;;  %v313_v54 = vsel %vm305_vm9, %v311_v50, %v297_v42  ;;  %v316_v56 = vsel %vm306_vm10, %v311_v50, %v300_v45 }
  0xbb   : > { %v317_v57 = vsel %vm307_vm11, %v311_v50, %v301_v46  ;;  %v328_v61 = vsel %vm320_vm12, %v327_v59, %v312_v52  ;;  %v329_v62 = vsel %vm321_vm13, %v327_v59, %v313_v54  ;;  %v1577_v63 = vmov 8  }
  0xbc   : > { %v330_v4 = vsel %vm322_vm14, %v324_v58, %v314_v51  ;;  %v332_v8 = vsel %vm322_vm14, %v327_v59, %v316_v56  ;;  %v333_v13 = vsel %vm323_vm15, %v327_v59, %v317_v57  ;;  %vm337_vm1 = vcmp.eq.s32.totalorder %v1726_v23, 8 }
  0xbd   : > { %vm338_vm2 = vcmp.eq.s32.totalorder %v1729_v24, 8  ;;  %vm339_vm3 = vcmp.eq.s32.totalorder %v1732_v25, 8  ;;  %v340_v14 = vstv %s1857_s8  ;;  %v344_v30 = vsel %vm336_vm0, %v343_v28, %v328_v61 }
  0xbe   : > { %v342_v26 = vsel %vm337_vm1, %v340_v14, %v326_v60  ;;  %v346_v29 = vsel %vm338_vm2, %v340_v14, %v330_v4  ;;  %v345_v31 = vsel %vm337_vm1, %v343_v28, %v329_v62  ;;  %v347_v32 = vsel %vm339_vm3, %v340_v14, %v331_v7 }
  0xbf   : > { %v348_v33 = vsel %vm338_vm2, %v343_v28, %v332_v8  ;;  %v349_v34 = vsel %vm339_vm3, %v343_v28, %v333_v13  ;;  %vm352_vm4 = vcmp.eq.s32.totalorder %v1723_v22, 9  ;;  %vm353_vm5 = vcmp.eq.s32.totalorder %v1726_v23, 9 }
  0xc0   : > { %1408 = vset.pattern.permute.xlu1 %v1572_v18  ;;  %609 = vperm.xlu2 %1406, %v1699_v15   ;;  %vm354_vm6 = vcmp.eq.s32.totalorder %v1729_v24, 9  ;;  %vm355_vm7 = vcmp.eq.s32.totalorder %v1732_v25, 9  ;;  %v356_v35 = vstv %s1875_s10  ;;  %vm368_vm8 = vcmp.eq.s32.totalorder %v1723_v22, 10 }
  0xc1   : > { %639 = vperm.xlu1 %1408, %v1703_v16   ;;  %v358_v39 = vsel %vm353_vm5, %v356_v35, %v342_v26  ;;  %v360_v40 = vsel %vm352_vm4, %v359_v37, %v344_v30  ;;  %vm369_vm9 = vcmp.eq.s32.totalorder %v1726_v23, 10  ;;  %v361_v41 = vsel %vm353_vm5, %v359_v37, %v345_v31 }
  0xc2   : > { %1418 = vset.pattern.permute.xlu0 %v1576_v36  ;;  %v362_v42 = vsel %vm354_vm6, %v356_v35, %v346_v29  ;;  %v363_v43 = vsel %vm355_vm7, %v356_v35, %v347_v32  ;;  %vm370_vm10 = vcmp.eq.s32.totalorder %v1729_v24, 10  ;;  %v365_v44 = vsel %vm355_vm7, %v359_v37, %v349_v34 }
  0xc3   : > { %753 = vperm.xlu0 %1418, %v1699_v15   ;;  %vm371_vm11 = vcmp.eq.s32.totalorder %v1732_v25, 10  ;;  %v372_v45 = vstv %s1894_s17  ;;  %v1578_v46 = vmov 9   ;;  %v376_v51 = vsel %vm368_vm8, %v375_v49, %v360_v40 }
  0xc4   : > { %v378_v50 = vsel %vm370_vm10, %v372_v45, %v362_v42  ;;  %v377_v52 = vsel %vm369_vm9, %v375_v49, %v361_v41  ;;  %v379_v54 = vsel %vm371_vm11, %v372_v45, %v363_v43  ;;  %v381_v56 = vsel %vm371_vm11, %v375_v49, %v365_v44 }
  0xc5   : > { %vm385_vm13 = vcmp.eq.s32.totalorder %v1726_v23, 11  ;;  %vm386_vm14 = vcmp.eq.s32.totalorder %v1729_v24, 11  ;;  %vm387_vm15 = vcmp.eq.s32.totalorder %v1732_v25, 11  ;;  %v388_v57 = vstv %s1908_s20  ;;  %s1164_s20 = scalar_lea.hbm %s2484_s3, %s1318_s11 }
  0xc6   : > { %v394_v62 = vsel %vm386_vm14, %v388_v57, %v378_v50  ;;  %v395_v4 = vsel %vm387_vm15, %v388_v57, %v379_v54  ;;  %vm401_vm1 = vcmp.eq.s32.totalorder %v1726_v23, 12  ;;  %vm402_vm2 = vcmp.eq.s32.totalorder %v1729_v24, 12 }
  0xc7   : > { %vm403_vm3 = vcmp.eq.s32.totalorder %v1732_v25, 12  ;;  %v404_v13 = vstv %s1929_s25  ;;  %v407_v26 = vstv %s1937_s26  ;;  %vm417_vm5 = vcmp.eq.s32.totalorder %v1726_v23, 13  ;;  %s1168_s26 = sshll.u32 %s1164_s20, 4  ;;  %s1169_s26 = int_to_ptr.hbm [resolvable:$true] %s1168_s26 }
  0xc8   : > { %1409 = vset.pattern.permute.xlu2 %v1572_v18  ;;  %v325_v18 = vsel %vm320_vm12, %v324_v58, %v309_v48  ;;  %v374_v48 = vsel %vm369_vm9, %v372_v45, %v358_v39  ;;  %vm384_vm12 = vcmp.eq.s32.totalorder %v1723_v22, 11  ;;  %v391_v58 = vstv %s1913_s24 }
  0xc9   : > { %645 = vperm.xlu1 %1408, %v1699_v15   ;;  %642 = vperm.xlu2 %1409, %v1687_v9   ;;  %v341_v17 = vsel %vm336_vm0, %v340_v14, %v325_v18  ;;  %vm400_vm0 = vcmp.eq.s32.totalorder %v1723_v22, 12  ;;  %v390_v18 = vsel %vm385_vm13, %v388_v57, %v374_v48  ;;  %v392_v60 = vsel %vm384_vm12, %v391_v58, %v376_v51 }
  0xca   : > { %v357_v38 = vsel %vm352_vm4, %v356_v35, %v341_v17  ;;  %v393_v61 = vsel %vm385_vm13, %v391_v58, %v377_v52  ;;  %v397_v8 = vsel %vm387_vm15, %v391_v58, %v381_v56  ;;  %v406_v17 = vsel %vm401_vm1, %v404_v13, %v390_v18 }
  0xcb   : > { %1421 = vset.pattern.permute.xlu0 %v1577_v63  ;;  %v373_v47 = vsel %vm368_vm8, %v372_v45, %v357_v38  ;;  %v410_v28 = vsel %vm402_vm2, %v404_v13, %v394_v62  ;;  %v408_v29 = vsel %vm400_vm0, %v407_v26, %v392_v60  ;;  %v409_v30 = vsel %vm401_vm1, %v407_v26, %v393_v61 }
  0xcc   : > { %816 = vperm.xlu0 %1421, %v1691_v10   ;;  %v389_v59 = vsel %vm384_vm12, %v388_v57, %v373_v47  ;;  %v411_v31 = vsel %vm403_vm3, %v404_v13, %v395_v4  ;;  %v413_v34 = vsel %vm403_vm3, %v407_v26, %v397_v8  ;;  %vm416_vm4 = vcmp.eq.s32.totalorder %v1723_v22, 13 }
  0xcd   : > { %v405_v14 = vsel %vm400_vm0, %v404_v13, %v389_v59  ;;  %vm419_vm7 = vcmp.eq.s32.totalorder %v1732_v25, 13  ;;  %v420_v35 = vstv %s1954_s27  ;;  %vm432_vm8 = vcmp.eq.s32.totalorder %v1723_v22, 14 }
  0xce   : > { %v421_v38 = vsel %vm416_vm4, %v420_v35, %v405_v14  ;;  %v422_v39 = vsel %vm417_vm5, %v420_v35, %v406_v17  ;;  %v427_v43 = vsel %vm419_vm7, %v420_v35, %v411_v31  ;;  %vm433_vm9 = vcmp.eq.s32.totalorder %v1726_v23, 14 }
  0xcf   : > { %vm435_vm11 = vcmp.eq.s32.totalorder %v1732_v25, 14  ;;  %v436_v45 = vstv %s1965_s29  ;;  %vm448_vm12 = vcmp.eq.s32.totalorder %v1723_v22, 15  ;;  %vm449_vm13 = vcmp.eq.s32.totalorder %v1726_v23, 15 }
  0xd0   : > { %v437_v47 = vsel %vm432_vm8, %v436_v45, %v421_v38  ;;  %v438_v48 = vsel %vm433_vm9, %v436_v45, %v422_v39  ;;  %v443_v54 = vsel %vm435_vm11, %v436_v45, %v427_v43  ;;  %vm451_vm15 = vcmp.eq.s32.totalorder %v1732_v25, 15 }
  0xd1   : > { %1412 = vset.pattern.permute.xlu1 %v1574_v27  ;;  %1410 = vset.pattern.permute.xlu2 %v1574_v27  ;;  %v364_v27 = vsel %vm354_vm6, %v359_v37, %v348_v33  ;;  %v1579_v33 = vmov 10   ;;  %vm418_vm6 = vcmp.eq.s32.totalorder %v1729_v24, 13  ;;  %v423_v37 = vstv %s1959_s28  ;;  %s1480_s28 = sshra.s32 %s1169_s26, 4  ;;  %s1481_s28 = int_to_ptr.hbm [resolvable:$true] %s1480_s28 }
  0xd2   : > { %678 = vperm.xlu1 %1412, %v1687_v9   ;;  %672 = vperm.xlu2 %1410, %v1691_v10   ;;  %v380_v55 = vsel %vm370_vm10, %v375_v49, %v364_v27  ;;  %v424_v40 = vsel %vm416_vm4, %v423_v37, %v408_v29  ;;  %v425_v41 = vsel %vm417_vm5, %v423_v37, %v409_v30  ;;  %vm434_vm10 = vcmp.eq.s32.totalorder %v1729_v24, 14  ;;  %s1482_s29 = scalar_lea.hbm %s1481_s28, 2  ;;  %p1487_p3 = scmp.lt.s32.totalorder %s1481_s28, %s2484_s3 }
  0xd3   : > { %v396_v7 = vsel %vm386_vm14, %v391_v58, %v380_v55  ;;  %v426_v42 = vsel %vm418_vm6, %v420_v35, %v410_v28  ;;  %v429_v44 = vsel %vm419_vm7, %v423_v37, %v413_v34  ;;  %v439_v49 = vstv %s1973_s30  ;;  %p1483_p0 = scmp.ne.s32.totalorder %s1481_s28, %s1482_s29 }
  0xd4   : > { %1425 = vset.pattern.permute.xlu0 %v1578_v46  ;;  %v412_v32 = vsel %vm402_vm2, %v407_v26, %v396_v7  ;;  %v442_v50 = vsel %vm434_vm10, %v436_v45, %v426_v42  ;;  %v440_v51 = vsel %vm432_vm8, %v439_v49, %v424_v40  ;;  %v441_v52 = vsel %vm433_vm9, %v439_v49, %v425_v41 }
  0xd5   : > { %855 = vperm.xlu0 %1425, %v1703_v16   ;;  %v428_v27 = vsel %vm418_vm6, %v423_v37, %v412_v32  ;;  %v445_v55 = vsel %vm435_vm11, %v439_v49, %v429_v44  ;;  %vm450_vm14 = vcmp.eq.s32.totalorder %v1729_v24, 15  ;;  %v452_v56 = vstv %s1981_s4  ;;  %p1484_p1 = pnand %p1483_p0, %p1647_p5 }
  0xd6   : > { %v455_v57 = vstv %s1987_s5  ;;  %v1580_v58 = vmov 11   ;;  %v453_v59 = vsel %vm448_vm12, %v452_v56, %v437_v47  ;;  %v454_v18 = vsel %vm449_vm13, %v452_v56, %v438_v48  ;;  %s1486_s5 = scalar_lea.hbm %s2484_s3, 4 }
  0xd7   : > { %v456_v60 = vsel %vm448_vm12, %v455_v57, %v440_v51  ;;  %v457_v61 = vsel %vm449_vm13, %v455_v57, %v441_v52  ;;  %v458_v22 = vsel %vm450_vm14, %v452_v56, %v442_v50  ;;  %v459_v62 = vsel %vm451_vm15, %v452_v56, %v443_v54  ;;  %p1485_p2 = pneg %p1484_p1  ;;  %p1488_p4 = scmp.lt.s32.totalorder %s1486_s5, %s1482_s29 }
  0xd8   : > { %v461_v7 = vsel %vm451_vm15, %v455_v57, %v445_v55  ;;  %v462_v23 = vsub.f32 %v453_v59, %v458_v22  ;;  %v463_v8 = vsub.f32 %v454_v18, %v459_v62  ;;  %v1582_v31 = vmov 12  }
  0xd9   : > { %v465_v13 = vsub.f32 %v457_v61, %v461_v7  ;;  %v1583_v34 = vmov 7   ;;  %v1584_v50 = vmov 14   ;;  %p1489_p7 = por %p1488_p4, %p1487_p3 }
  0xda   : > { %1413 = vset.pattern.permute.xlu1 %v1575_v53  ;;  %681 = vperm.xlu2 %1410, %v1699_v15   ;;  %v466_v25 = vmul.f32 %v462_v23, %v462_v23  ;;  %v467_v14 = vmul.f32 %v463_v8, %v463_v8 }
  0xdb   : > { %708 = vperm.xlu1 %1413, %v1691_v10   ;;  %v469_v26 = vmul.f32 %v465_v13, %v465_v13  ;;  %p1490_p8 = pnand %p1489_p7, %p1485_p2 }
  0xdd   : > { %1429 = vset.pattern.permute.xlu0 %v1579_v33  ;;  %v471_v29 = vadd.f32 %v469_v26, %v467_v14 }
  0xde   : > { %894 = vperm.xlu0 %1429, %v1687_v9  }
  0xdf   : > { %vm491_vm2 = vcmp.eq.f32.partialorder %v471_v29, inf  ;;  %vm493_vm3 = vcmp.eq.f32.partialorder %v471_v29, 0.0 }
  0xe2   : > { %1414 = vset.pattern.permute.xlu2 %v1575_v53  ;;  %v444_v53 = vsel %vm434_vm10, %v439_v49, %v428_v27  ;;  %v494_v49 = vand.u32 2147483648, %v471_v29 }
  0xe3   : > { %717 = vperm.xlu1 %1413, %v1699_v15   ;;  %711 = vperm.xlu2 %1414, %v1703_v16   ;;  %v460_v4 = vsel %vm450_vm14, %v455_v57, %v444_v53 }
  0xe4   : > { %v464_v24 = vsub.f32 %v456_v60, %v460_v4 }
  0xe6   : > { %1432 = vset.pattern.permute.xlu0 %v1580_v58  ;;  %v468_v17 = vmul.f32 %v464_v24, %v464_v24 }
  0xe7   : > { %933 = vperm.xlu0 %1432, %v1699_v15  }
  0xe8   : > { %v470_v28 = vadd.f32 %v468_v17, %v466_v25 }
  0xea   : > { %1444 = vrsqrt.f32 %v470_v28  ;;  %vm479_vm0 = vcmp.eq.f32.partialorder %v470_v28, inf  ;;  %v482_v45 = vand.u32 2147483648, %v470_v28  ;;  %vm481_vm1 = vcmp.eq.f32.partialorder %v470_v28, 0.0 }
  0xeb   : > { %1417 = vset.pattern.permute.xlu1 %v1576_v36  ;;  %1416 = vset.pattern.permute.xlu2 %v1576_v36  ;;  %1446 = vrsqrt.f32 %v471_v29 }
  0xec   : > { %747 = vperm.xlu1 %1417, %v1703_v16   ;;  %744 = vperm.xlu2 %1416, %v1691_v10  }
  0xef   : > { %1073 = vrot.lane.b32.xlu0 %v1676_v2, %s1581_s6  ;;  %v529_v30 = vpop.permute.xlu2 %528 }
  0xf0   : > { %1435 = vset.pattern.permute.xlu0 %v1582_v31  ;;  %v1445_v32 = vpop.eup %1444  ;;  %vm539_vm4 = vcmp.eq.s32.totalorder %v1713_v20, %v529_v30  ;;  %vm540_vm5 = vcmp.eq.s32.totalorder %v1716_v21, %v529_v30 }
  0xf1   : > { %v1447_v36 = vpop.eup %1446  ;;  %v473_v35 = vmul.f32 %v1445_v32, %v470_v28 }
  0xf2   : > { %v485_v37 = vmul.f32 %v1447_v36, %v471_v29 }
  0xf3   : > { %v474_v38 = vmul.f32 %v1445_v32, %v473_v35 }
  0xf4   : > { %1419 = vset.pattern.permute.xlu1 %v1583_v34  ;;  %750 = vperm.xlu2 %1416, %v1687_v9   ;;  %v486_v39 = vmul.f32 %v1447_v36, %v485_v37 }
  0xf5   : > { %780 = vperm.xlu1 %1419, %v1691_v10   ;;  %v475_v41 = vmul.f32 0.5, %v474_v38 }
  0xf6   : > { %v487_v42 = vmul.f32 0.5, %v486_v39 }
  0xf7   : > { %969 = vperm.xlu0 %1435, %v1699_v15   ;;  %v476_v43 = vsub.f32 1.5, %v475_v41 }
  0xf8   : > { %v2024_v40 = vpop.permute.xlu2 %531  ;;  %v488_v27 = vsub.f32 1.5, %v487_v42 }
  0xf9   : > { %v477_v44 = vmul.f32 %v1445_v32, %v476_v43 }
  0xfa   : > { %v489_v47 = vmul.f32 %v1447_v36, %v488_v27 }
  0xfb   : > { %v478_v48 = vmul.f32 %v477_v44, %v470_v28 }
  0xfc   : > { %1420 = vset.pattern.permute.xlu2 %v1583_v34  ;;  %v490_v51 = vmul.f32 %v489_v47, %v471_v29 }
  0xfd   : > { %786 = vperm.xlu1 %1419, %v1687_v9   ;;  %783 = vperm.xlu2 %1420, %v1703_v16   ;;  %v480_v52 = vsel %vm479_vm0, %v470_v28, %v478_v48  ;;  %vm541_vm0 = vcmp.eq.s32.totalorder %v1713_v20, %v2024_v40 }
  0xfe   : > { %v2032_v53 = vsel %vm481_vm1, %v482_v45, %v480_v52  ;;  %v492_v55 = vsel %vm491_vm2, %v471_v29, %v490_v51  ;;  %vm542_vm1 = vcmp.eq.s32.totalorder %v1716_v21, %v2024_v40 }
  0xff   : > { %1438 = vset.pattern.permute.xlu0 %v1584_v50  ;;  %v2036_v56 = vsel %vm493_vm3, %v494_v49, %v492_v55  ;;  %v547_v57 = vsel %vm539_vm4, %v2032_v53, 0.0  ;;  %v549_v35 = vsel %vm541_vm0, %v2032_v53, 0.0 }
 0x100   : > { %1032 = vperm.xlu0 %1438, %v1691_v10   ;;  %v548_v18 = vsel %vm540_vm5, %v2036_v56, 0.0  ;;  %v550_v37 = vsel %vm542_vm1, %v2036_v56, 0.0 }
 0x101   : > { %v565_v54 = vpop.permute.xlu2 %564 }
 0x102   : > { %vm575_vm6 = vcmp.eq.s32.totalorder %v1713_v20, %v565_v54  ;;  %vm576_vm7 = vcmp.eq.s32.totalorder %v1716_v21, %v565_v54 }
 0x103   : > { %v583_v59 = vsel %vm575_vm6, %v2032_v53, 0.0  ;;  %v584_v60 = vsel %vm576_vm7, %v2036_v56, 0.0 }
 0x104   : > { %v2042_v61 = vadd.f32 %v583_v59, %v547_v57  ;;  %v2044_v22 = vadd.f32 %v584_v60, %v548_v18 }
 0x105   : > { %1422 = vset.pattern.permute.xlu1 %v1577_v63  ;;  %789 = vperm.xlu2 %1420, %v1699_v15  }
 0x106   : > { %819 = vperm.xlu1 %1422, %v1703_v16  }
 0x107   : > { %v535_v62 = vpop.permute.xlu0 %534 }
 0x108   : > { %vm543_vm8 = vcmp.eq.s32.totalorder %v1713_v20, %v535_v62  ;;  %vm544_vm9 = vcmp.eq.s32.totalorder %v1716_v21, %v535_v62 }
 0x109   : > { %v551_v4 = vsel %vm543_vm8, %v2032_v53, 0.0  ;;  %v552_v7 = vsel %vm544_vm9, %v2036_v56, 0.0  ;;  %v571_v23 = vpop.permute.xlu2 %570 }
 0x10a   : > { %vm579_vm10 = vcmp.eq.s32.totalorder %v1713_v20, %v571_v23  ;;  %vm580_vm11 = vcmp.eq.s32.totalorder %v1716_v21, %v571_v23 }
 0x10b   : > { %v587_v8 = vsel %vm579_vm10, %v2032_v53, 0.0  ;;  %v588_v24 = vsel %vm580_vm11, %v2036_v56, 0.0 }
 0x10c   : > { %v2057_v13 = vadd.f32 %v587_v8, %v551_v4  ;;  %v2059_v25 = vadd.f32 %v588_v24, %v552_v7 }
 0x10d   : > { %1423 = vset.pattern.permute.xlu2 %v1577_v63 }
 0x10e   : > { %825 = vperm.xlu1 %1422, %v1699_v15   ;;  %822 = vperm.xlu2 %1423, %v1687_v9  }
 0x10f   : > { %v538_v14 = vpop.permute.xlu1 %537 }
 0x110   : > { %vm545_vm12 = vcmp.eq.s32.totalorder %v1713_v20, %v538_v14  ;;  %vm546_vm13 = vcmp.eq.s32.totalorder %v1716_v21, %v538_v14  ;;  %v574_v17 = vpop.permute.xlu0 %573 }
 0x111   : > { %v553_v26 = vsel %vm545_vm12, %v2032_v53, 0.0  ;;  %v554_v28 = vsel %vm546_vm13, %v2036_v56, 0.0  ;;  %vm581_vm14 = vcmp.eq.s32.totalorder %v1713_v20, %v574_v17  ;;  %vm582_vm15 = vcmp.eq.s32.totalorder %v1716_v21, %v574_v17 }
 0x112   : > { %v589_v63 = vsel %vm581_vm14, %v2032_v53, 0.0  ;;  %v590_v29 = vsel %vm582_vm15, %v2036_v56, 0.0  ;;  %v604_v30 = vpop.permute.xlu2 %603 }
 0x113   : > { %v597_v32 = vadd.f32 %v589_v63, %v553_v26  ;;  %v598_v34 = vadd.f32 %v590_v29, %v554_v28  ;;  %vm613_vm2 = vcmp.eq.s32.totalorder %v1713_v20, %v604_v30  ;;  %vm614_vm3 = vcmp.eq.s32.totalorder %v1716_v21, %v604_v30 }
 0x114   : > { %v621_v42 = vsel %vm613_vm2, %v2032_v53, 0.0  ;;  %v622_v43 = vsel %vm614_vm3, %v2036_v56, 0.0 }
 0x116   : > { %1426 = vset.pattern.permute.xlu1 %v1578_v46  ;;  %1424 = vset.pattern.permute.xlu2 %v1578_v46 }
 0x117   : > { %858 = vperm.xlu1 %1426, %v1687_v9   ;;  %852 = vperm.xlu2 %1424, %v1691_v10  }
 0x119   : > { %v568_v36 = vpop.permute.xlu1 %567 }
 0x11a   : > { %vm577_vm4 = vcmp.eq.s32.totalorder %v1713_v20, %v568_v36  ;;  %vm578_vm5 = vcmp.eq.s32.totalorder %v1716_v21, %v568_v36  ;;  %v610_v46 = vpop.permute.xlu2 %609  ;;  %v637_v51 = vpop.permute.xlu0 %636 }
 0x11b   : > { %v585_v38 = vsel %vm577_vm4, %v2032_v53, 0.0  ;;  %v586_v39 = vsel %vm578_vm5, %v2036_v56, 0.0  ;;  %vm617_vm6 = vcmp.eq.s32.totalorder %v1713_v20, %v610_v46  ;;  %vm618_vm7 = vcmp.eq.s32.totalorder %v1716_v21, %v610_v46 }
 0x11c   : > { %v593_v41 = vadd.f32 %v585_v38, %v549_v35  ;;  %v594_v40 = vadd.f32 %v586_v39, %v550_v37  ;;  %v625_v27 = vsel %vm617_vm6, %v2032_v53, 0.0  ;;  %v626_v44 = vsel %vm618_vm7, %v2036_v56, 0.0 }
 0x11d   : > { %v2094_v48 = vadd.f32 %v625_v27, %v597_v32  ;;  %v2096_v49 = vadd.f32 %v626_v44, %v598_v34  ;;  %vm647_vm8 = vcmp.eq.s32.totalorder %v1713_v20, %v637_v51  ;;  %vm648_vm9 = vcmp.eq.s32.totalorder %v1716_v21, %v637_v51 }
 0x11e   : > { %v629_v45 = vadd.f32 %v621_v42, %v593_v41  ;;  %v630_v47 = vadd.f32 %v622_v43, %v594_v40  ;;  %v655_v60 = vsel %vm647_vm8, %v2032_v53, 0.0  ;;  %v656_v62 = vsel %vm648_vm9, %v2036_v56, 0.0 }
 0x11f   : > { %1427 = vset.pattern.permute.xlu1 %v1579_v33  ;;  %861 = vperm.xlu2 %1424, %v1699_v15  }
 0x120   : > { %888 = vperm.xlu1 %1427, %v1691_v10  }
 0x122   : > { %v601_v52 = vpop.permute.xlu1 %600 }
 0x123   : > { %vm611_vm10 = vcmp.eq.s32.totalorder %v1713_v20, %v601_v52  ;;  %vm612_vm11 = vcmp.eq.s32.totalorder %v1716_v21, %v601_v52  ;;  %v643_v54 = vpop.permute.xlu2 %642 }
 0x124   : > { %v619_v55 = vsel %vm611_vm10, %v2032_v53, 0.0  ;;  %v620_v57 = vsel %vm612_vm11, %v2036_v56, 0.0  ;;  %vm651_vm12 = vcmp.eq.s32.totalorder %v1713_v20, %v643_v54  ;;  %vm652_vm13 = vcmp.eq.s32.totalorder %v1716_v21, %v643_v54 }
 0x125   : > { %v627_v59 = vadd.f32 %v619_v55, %v2042_v61  ;;  %v628_v18 = vadd.f32 %v620_v57, %v2044_v22  ;;  %v659_v14 = vsel %vm651_vm12, %v2032_v53, 0.0  ;;  %v660_v17 = vsel %vm652_vm13, %v2036_v56, 0.0 }
 0x127   : > { %1428 = vset.pattern.permute.xlu2 %v1579_v33  ;;  %v663_v4 = vadd.f32 %v655_v60, %v627_v59  ;;  %v664_v7 = vadd.f32 %v656_v62, %v628_v18  ;;  %v1448_v59 = vld [vmem:[%s1665_s7] sm:$0xff]  ;;  %v1449_v60 = vld [vmem:[%s1665_s7 + $0x8] sm:$0xff] }
 0x128   : > { %897 = vperm.xlu1 %1427, %v1699_v15   ;;  %891 = vperm.xlu2 %1428, %v1703_v16  }
 0x12a   : > { %v607_v23 = vpop.permute.xlu1 %606 }
 0x12b   : > { %vm615_vm14 = vcmp.eq.s32.totalorder %v1713_v20, %v607_v23  ;;  %vm616_vm15 = vcmp.eq.s32.totalorder %v1716_v21, %v607_v23 }
 0x12c   : > { %v623_v61 = vsel %vm615_vm14, %v2032_v53, 0.0  ;;  %v624_v22 = vsel %vm616_vm15, %v2036_v56, 0.0  ;;  %v673_v33 = vpop.permute.xlu2 %672 }
 0x12d   : > { %v631_v8 = vadd.f32 %v623_v61, %v2057_v13  ;;  %v632_v24 = vadd.f32 %v624_v22, %v2059_v25  ;;  %vm683_vm0 = vcmp.eq.s32.totalorder %v1713_v20, %v673_v33  ;;  %vm684_vm1 = vcmp.eq.s32.totalorder %v1716_v21, %v673_v33  ;;  %v676_v13 = vpop.permute.xlu0 %675 }
 0x12e   : > { %v691_v26 = vsel %vm683_vm0, %v2032_v53, 0.0  ;;  %v692_v28 = vsel %vm684_vm1, %v2036_v56, 0.0  ;;  %vm685_vm2 = vcmp.eq.s32.totalorder %v1713_v20, %v676_v13  ;;  %vm686_vm3 = vcmp.eq.s32.totalorder %v1716_v21, %v676_v13 }
 0x12f   : > { %v667_v63 = vadd.f32 %v659_v14, %v631_v8  ;;  %v668_v29 = vadd.f32 %v660_v17, %v632_v24  ;;  %v2128_v30 = vadd.f32 %v691_v26, %v663_v4  ;;  %v2130_v32 = vadd.f32 %v692_v28, %v664_v7  ;;  %v1450_v8 = vld [vmem:[%s1665_s7 + $0x10] sm:$0xff]  ;;  %s2420_s7 = sand.u32 1, %s1556_s13  }
 0x130   : > { %1431 = vset.pattern.permute.xlu1 %v1580_v58  ;;  %1430 = vset.pattern.permute.xlu2 %v1580_v58  ;;  %v693_v37 = vsel %vm685_vm2, %v2032_v53, 0.0  ;;  %v694_v38 = vsel %vm686_vm3, %v2036_v56, 0.0  ;;  %s1279_s8 = sshll.u32 %s2420_s7, 5  ;;  %s1280_s10 = sshll.u32 %s2420_s7, 1 }
 0x131   : > { %927 = vperm.xlu1 %1431, %v1703_v16   ;;  %924 = vperm.xlu2 %1430, %v1691_v10   ;;  %s2423_s9 = scalar_lea.vmem [#allocation5], %s1279_s8  ;;  %s191_s24 = scalar_lea.vmem [#allocation6], %s1280_s10 }
 0x132   : > { %s1166_s25 = sshll.u32 %s191_s24, 4  ;;  %s1137_s27 = scalar_lea.sflag [#allocation7], %s2420_s7  ;;  %s1167_s25 = int_to_ptr.vmem [resolvable:$true] %s1166_s25 }
 0x133   : > { %v640_v25 = vpop.permute.xlu1 %639 }
 0x134   : > { %vm649_vm4 = vcmp.eq.s32.totalorder %v1713_v20, %v640_v25  ;;  %vm650_vm5 = vcmp.eq.s32.totalorder %v1716_v21, %v640_v25  ;;  %v682_v34 = vpop.permute.xlu2 %681 }
 0x135   : > { %v657_v36 = vsel %vm649_vm4, %v2032_v53, 0.0  ;;  %v658_v46 = vsel %vm650_vm5, %v2036_v56, 0.0  ;;  %vm689_vm8 = vcmp.eq.s32.totalorder %v1713_v20, %v682_v34  ;;  %vm690_vm9 = vcmp.eq.s32.totalorder %v1716_v21, %v682_v34  ;;  %v715_v18 = vpop.permute.xlu0 %714 }
 0x136   : > { %v665_v58 = vadd.f32 %v657_v36, %v629_v45  ;;  %v666_v35 = vadd.f32 %v658_v46, %v630_v47  ;;  %v697_v52 = vsel %vm689_vm8, %v2032_v53, 0.0  ;;  %v698_v54 = vsel %vm690_vm9, %v2036_v56, 0.0 }
 0x137   : > { %vm723_vm12 = vcmp.eq.s32.totalorder %v1713_v20, %v715_v18  ;;  %vm724_vm13 = vcmp.eq.s32.totalorder %v1716_v21, %v715_v18 }
 0x138   : > { %v701_v39 = vadd.f32 %v693_v37, %v665_v58  ;;  %v702_v41 = vadd.f32 %v694_v38, %v666_v35  ;;  %v731_v33 = vsel %vm723_vm12, %v2032_v53, 0.0  ;;  %v1585_v37 = vmov 13  }
 0x139   : > { %1433 = vset.pattern.permute.xlu1 %v1582_v31  ;;  %930 = vperm.xlu2 %1430, %v1687_v9  }
 0x13a   : > { %960 = vperm.xlu1 %1433, %v1691_v10  }
 0x13b   : > { %v646_v40 = vpop.permute.xlu1 %645 }
 0x13c   : > { %vm653_vm6 = vcmp.eq.s32.totalorder %v1713_v20, %v646_v40  ;;  %vm654_vm7 = vcmp.eq.s32.totalorder %v1716_v21, %v646_v40 }
 0x13d   : > { %v661_v42 = vsel %vm653_vm6, %v2032_v53, 0.0  ;;  %v662_v43 = vsel %vm654_vm7, %v2036_v56, 0.0  ;;  %v712_v27 = vpop.permute.xlu2 %711 }
 0x13e   : > { %v669_v44 = vadd.f32 %v661_v42, %v2094_v48  ;;  %v670_v45 = vadd.f32 %v662_v43, %v2096_v49  ;;  %vm721_vm10 = vcmp.eq.s32.totalorder %v1713_v20, %v712_v27  ;;  %vm722_vm11 = vcmp.eq.s32.totalorder %v1716_v21, %v712_v27 }
 0x13f   : > { %v729_v47 = vsel %vm721_vm10, %v2032_v53, 0.0  ;;  %v730_v51 = vsel %vm722_vm11, %v2036_v56, 0.0 }
 0x140   : > { %v2161_v55 = vadd.f32 %v729_v47, %v701_v39  ;;  %v2163_v57 = vadd.f32 %v730_v51, %v702_v41  ;;  %v705_v48 = vadd.f32 %v697_v52, %v669_v44  ;;  %v706_v49 = vadd.f32 %v698_v54, %v670_v45  ;;  %v754_v39 = vpop.permute.xlu0 %753 }
 0x141   : > { %1067 = vrot.lane.b32.xlu2 %v1448_v59, %s1581_s6  ;;  %vm761_vm6 = vcmp.eq.s32.totalorder %v1713_v20, %v754_v39  ;;  %vm762_vm7 = vcmp.eq.s32.totalorder %v1716_v21, %v754_v39 }
 0x142   : > { %1069 = vrot.lane.b32.xlu1 %v1449_v60, %s1581_s6  ;;  %1434 = vset.pattern.permute.xlu2 %v1582_v31  ;;  %v732_v31 = vsel %vm724_vm13, %v2036_v56, 0.0  ;;  %v769_v44 = vsel %vm761_vm6, %v2032_v53, 0.0 }
 0x144   : > { %v679_v62 = vpop.permute.xlu1 %678 }
 0x145   : > { %vm687_vm14 = vcmp.eq.s32.totalorder %v1713_v20, %v679_v62  ;;  %vm688_vm15 = vcmp.eq.s32.totalorder %v1716_v21, %v679_v62 }
 0x146   : > { %v695_v4 = vsel %vm687_vm14, %v2032_v53, 0.0  ;;  %v696_v7 = vsel %vm688_vm15, %v2036_v56, 0.0  ;;  %v745_v23 = vpop.permute.xlu2 %744 }
 0x147   : > { %v703_v61 = vadd.f32 %v695_v4, %v667_v63  ;;  %v704_v22 = vadd.f32 %v696_v7, %v668_v29  ;;  %vm755_vm0 = vcmp.eq.s32.totalorder %v1713_v20, %v745_v23  ;;  %vm756_vm1 = vcmp.eq.s32.totalorder %v1716_v21, %v745_v23 }
 0x148   : > { %v763_v36 = vsel %vm755_vm0, %v2032_v53, 0.0  ;;  %v764_v46 = vsel %vm756_vm1, %v2036_v56, 0.0 }
 0x149   : > { %1071 = vrot.lane.b32.xlu2 %v1450_v8, %s1581_s6  ;;  %v739_v24 = vadd.f32 %v731_v33, %v703_v61  ;;  %v740_v14 = vadd.f32 %v732_v31, %v704_v22 }
 0x14a   : > { %963 = vperm.xlu1 %1433, %v1703_v16  }
 0x14d   : > { %v709_v17 = vpop.permute.xlu1 %708 }
 0x14e   : > { %vm719_vm2 = vcmp.eq.s32.totalorder %v1713_v20, %v709_v17  ;;  %vm720_vm3 = vcmp.eq.s32.totalorder %v1716_v21, %v709_v17  ;;  %v751_v26 = vpop.permute.xlu2 %750 }
 0x14f   : > { %v727_v28 = vsel %vm719_vm2, %v2032_v53, 0.0  ;;  %v728_v63 = vsel %vm720_vm3, %v2036_v56, 0.0  ;;  %vm759_vm4 = vcmp.eq.s32.totalorder %v1713_v20, %v751_v26  ;;  %vm760_vm5 = vcmp.eq.s32.totalorder %v1716_v21, %v751_v26 }
 0x150   : > { %v735_v29 = vadd.f32 %v727_v28, %v2128_v30  ;;  %v736_v13 = vadd.f32 %v728_v63, %v2130_v32  ;;  %v767_v25 = vsel %vm759_vm4, %v2032_v53, 0.0  ;;  %v768_v34 = vsel %vm760_vm5, %v2036_v56, 0.0 }
 0x151   : > { %v2195_v58 = vadd.f32 %v767_v25, %v739_v24  ;;  %v2197_v35 = vadd.f32 %v768_v34, %v740_v14  ;;  %966 = vperm.xlu2 %1434, %v1687_v9  }
 0x152   : > { %1436 = vset.pattern.permute.xlu1 %v1585_v37  ;;  %v771_v38 = vadd.f32 %v763_v36, %v735_v29  ;;  %v772_v30 = vadd.f32 %v764_v46, %v736_v13 }
 0x153   : > { %996 = vperm.xlu1 %1436, %v1691_v10   ;;  %v770_v10 = vsel %vm762_vm7, %v2036_v56, 0.0 }
 0x155   : > { %v718_v32 = vpop.permute.xlu1 %717 }
 0x156   : > { %vm725_vm8 = vcmp.eq.s32.totalorder %v1713_v20, %v718_v32  ;;  %vm726_vm9 = vcmp.eq.s32.totalorder %v1716_v21, %v718_v32 }
 0x157   : > { %v733_v41 = vsel %vm725_vm8, %v2032_v53, 0.0  ;;  %v734_v40 = vsel %vm726_vm9, %v2036_v56, 0.0  ;;  %v784_v42 = vpop.permute.xlu2 %783 }
 0x158   : > { %v741_v43 = vadd.f32 %v733_v41, %v705_v48  ;;  %v742_v27 = vadd.f32 %v734_v40, %v706_v49  ;;  %vm793_vm10 = vcmp.eq.s32.totalorder %v1713_v20, %v784_v42  ;;  %vm794_vm11 = vcmp.eq.s32.totalorder %v1716_v21, %v784_v42 }
 0x159   : > { %1437 = vset.pattern.permute.xlu2 %v1585_v37  ;;  %v801_v62 = vsel %vm793_vm10, %v2032_v53, 0.0  ;;  %v802_v4 = vsel %vm794_vm11, %v2036_v56, 0.0 }
 0x15a   : > { %999 = vperm.xlu2 %1437, %v1703_v16   ;;  %v777_v45 = vadd.f32 %v769_v44, %v741_v43  ;;  %v778_v47 = vadd.f32 %v770_v10, %v742_v27 }
 0x15b   : > { %1002 = vperm.xlu1 %1436, %v1687_v9  }
 0x15e   : > { %v748_v51 = vpop.permute.xlu1 %747 }
 0x15f   : > { %vm757_vm12 = vcmp.eq.s32.totalorder %v1713_v20, %v748_v51  ;;  %vm758_vm13 = vcmp.eq.s32.totalorder %v1716_v21, %v748_v51  ;;  %v790_v52 = vpop.permute.xlu2 %789  ;;  %v1586_v51 = vmov 15  }
 0x160   : > { %v765_v54 = vsel %vm757_vm12, %v2032_v53, 0.0  ;;  %v766_v59 = vsel %vm758_vm13, %v2036_v56, 0.0  ;;  %vm797_vm14 = vcmp.eq.s32.totalorder %v1713_v20, %v790_v52  ;;  %vm798_vm15 = vcmp.eq.s32.totalorder %v1716_v21, %v790_v52  ;;  %1442 = vset.pattern.permute.xlu0 %v1586_v51 }
 0x161   : > { %v773_v48 = vadd.f32 %v765_v54, %v2161_v55  ;;  %v774_v49 = vadd.f32 %v766_v59, %v2163_v57  ;;  %v805_v18 = vsel %vm797_vm14, %v2032_v53, 0.0  ;;  %v806_v60 = vsel %vm798_vm15, %v2036_v56, 0.0  ;;  %v817_v57 = vpop.permute.xlu0 %816 }
 0x162   : > { %v2225_v7 = vadd.f32 %v805_v18, %v777_v45  ;;  %v2227_v23 = vadd.f32 %v806_v60, %v778_v47  ;;  %1005 = vperm.xlu2 %1437, %v1699_v15   ;;  %vm827_vm0 = vcmp.eq.s32.totalorder %v1713_v20, %v817_v57  ;;  %vm828_vm1 = vcmp.eq.s32.totalorder %v1716_v21, %v817_v57 }
 0x163   : > { %1439 = vset.pattern.permute.xlu1 %v1584_v50  ;;  %v809_v61 = vadd.f32 %v801_v62, %v773_v48  ;;  %v810_v55 = vadd.f32 %v802_v4, %v774_v49  ;;  %v836_v17 = vsel %vm828_vm1, %v2036_v56, 0.0 }
 0x164   : > { %1035 = vperm.xlu1 %1439, %v1703_v16   ;;  %v835_v16 = vsel %vm827_vm0, %v2032_v53, 0.0 }
 0x167   : > { %v781_v22 = vpop.permute.xlu1 %780 }
 0x168   : > { %vm791_vm2 = vcmp.eq.s32.totalorder %v1713_v20, %v781_v22  ;;  %vm792_vm3 = vcmp.eq.s32.totalorder %v1716_v21, %v781_v22  ;;  %v823_v33 = vpop.permute.xlu2 %822 }
 0x169   : > { %v799_v31 = vsel %vm791_vm2, %v2032_v53, 0.0  ;;  %v800_v8 = vsel %vm792_vm3, %v2036_v56, 0.0  ;;  %vm831_vm6 = vcmp.eq.s32.totalorder %v1713_v20, %v823_v33  ;;  %vm832_vm7 = vcmp.eq.s32.totalorder %v1716_v21, %v823_v33  ;;  %v856_v39 = vpop.permute.xlu0 %855 }
 0x16a   : > { %v807_v24 = vadd.f32 %v799_v31, %v771_v38  ;;  %v808_v14 = vadd.f32 %v800_v8, %v772_v30  ;;  %1440 = vset.pattern.permute.xlu2 %v1584_v50  ;;  %v839_v36 = vsel %vm831_vm6, %v2032_v53, 0.0  ;;  %v840_v46 = vsel %vm832_vm7, %v2036_v56, 0.0 }
 0x16b   : > { %1038 = vperm.xlu2 %1440, %v1687_v9   ;;  %vm865_vm10 = vcmp.eq.s32.totalorder %v1713_v20, %v856_v39  ;;  %vm866_vm11 = vcmp.eq.s32.totalorder %v1716_v21, %v856_v39 }
 0x16c   : > { %1041 = vperm.xlu1 %1439, %v1699_v15   ;;  %v843_v26 = vadd.f32 %v835_v16, %v807_v24  ;;  %v844_v28 = vadd.f32 %v836_v17, %v808_v14  ;;  %v873_v27 = vsel %vm865_vm10, %v2032_v53, 0.0  ;;  %v874_v44 = vsel %vm866_vm11, %v2036_v56, 0.0 }
 0x16f   : > { %v787_v63 = vpop.permute.xlu1 %786 }
 0x170   : > { %vm795_vm4 = vcmp.eq.s32.totalorder %v1713_v20, %v787_v63  ;;  %vm796_vm5 = vcmp.eq.s32.totalorder %v1716_v21, %v787_v63 }
 0x171   : > { %v803_v50 = vsel %vm795_vm4, %v2032_v53, 0.0  ;;  %v804_v29 = vsel %vm796_vm5, %v2036_v56, 0.0  ;;  %v853_v13 = vpop.permute.xlu2 %852  ;;  %v895_v22 = vpop.permute.xlu0 %894 }
 0x172   : > { %v811_v9 = vadd.f32 %v803_v50, %v2195_v58  ;;  %v812_v15 = vadd.f32 %v804_v29, %v2197_v35  ;;  %vm863_vm8 = vcmp.eq.s32.totalorder %v1713_v20, %v853_v13  ;;  %vm864_vm9 = vcmp.eq.s32.totalorder %v1716_v21, %v853_v13 }
 0x173   : > { %v871_v25 = vsel %vm863_vm8, %v2032_v53, 0.0  ;;  %v872_v34 = vsel %vm864_vm9, %v2036_v56, 0.0  ;;  %1441 = vset.pattern.permute.xlu2 %v1586_v51  ;;  %vm903_vm4 = vcmp.eq.s32.totalorder %v1713_v20, %v895_v22  ;;  %vm904_vm5 = vcmp.eq.s32.totalorder %v1716_v21, %v895_v22 }
 0x174   : > { %v2257_v37 = vadd.f32 %v871_v25, %v843_v26  ;;  %v2259_v38 = vadd.f32 %v872_v34, %v844_v28  ;;  %v847_v30 = vadd.f32 %v839_v36, %v811_v9  ;;  %v848_v58 = vadd.f32 %v840_v46, %v812_v15  ;;  %1443 = vset.pattern.permute.xlu1 %v1586_v51 }
 0x175   : > { %v911_v16 = vsel %vm903_vm4, %v2032_v53, 0.0  ;;  %v912_v17 = vsel %vm904_vm5, %v2036_v56, 0.0 }
 0x178   : > { %v820_v35 = vpop.permute.xlu1 %819 }
 0x179   : > { %vm829_vm12 = vcmp.eq.s32.totalorder %v1713_v20, %v820_v35  ;;  %vm830_vm13 = vcmp.eq.s32.totalorder %v1716_v21, %v820_v35  ;;  %v862_v32 = vpop.permute.xlu2 %861  ;;  %v934_v39 = vpop.permute.xlu0 %933 }
 0x17a   : > { %v837_v41 = vsel %vm829_vm12, %v2032_v53, 0.0  ;;  %v838_v40 = vsel %vm830_vm13, %v2036_v56, 0.0  ;;  %vm869_vm14 = vcmp.eq.s32.totalorder %v1713_v20, %v862_v32  ;;  %vm870_vm15 = vcmp.eq.s32.totalorder %v1716_v21, %v862_v32 }
 0x17b   : > { %v845_v42 = vadd.f32 %v837_v41, %v809_v61  ;;  %v846_v43 = vadd.f32 %v838_v40, %v810_v55  ;;  %v877_v18 = vsel %vm869_vm14, %v2032_v53, 0.0  ;;  %v878_v60 = vsel %vm870_vm15, %v2036_v56, 0.0 }
 0x17c   : > { %vm941_vm14 = vcmp.eq.s32.totalorder %v1713_v20, %v934_v39  ;;  %vm942_vm15 = vcmp.eq.s32.totalorder %v1716_v21, %v934_v39 }
 0x17d   : > { %v881_v10 = vadd.f32 %v873_v27, %v845_v42  ;;  %v882_v45 = vadd.f32 %v874_v44, %v846_v43  ;;  %v949_v44 = vsel %vm941_vm14, %v2032_v53, 0.0 }
 0x180   : > { %v826_v47 = vpop.permute.xlu1 %825 }
 0x181   : > { %vm833_vm0 = vcmp.eq.s32.totalorder %v1713_v20, %v826_v47  ;;  %vm834_vm1 = vcmp.eq.s32.totalorder %v1716_v21, %v826_v47  ;;  %v1074_v51 = vpop.permute.xlu0 %1073 }
 0x182   : > { %v841_v52 = vsel %vm833_vm0, %v2032_v53, 0.0  ;;  %v842_v54 = vsel %vm834_vm1, %v2036_v56, 0.0  ;;  %v892_v59 = vpop.permute.xlu2 %891 }
 0x183   : > { %v849_v48 = vadd.f32 %v841_v52, %v2225_v7  ;;  %v850_v49 = vadd.f32 %v842_v54, %v2227_v23  ;;  %vm901_vm2 = vcmp.eq.s32.totalorder %v1713_v20, %v892_v59  ;;  %vm902_vm3 = vcmp.eq.s32.totalorder %v1716_v21, %v892_v59 }
 0x184   : > { %v909_v62 = vsel %vm901_vm2, %v2032_v53, 0.0  ;;  %v910_v4 = vsel %vm902_vm3, %v2036_v56, 0.0  ;;  %v1078_v52 = vadd.s32 %v1074_v51, %v514_v11 }
 0x185   : > { %v2283_v61 = vadd.f32 %v909_v62, %v881_v10  ;;  %v2285_v55 = vadd.f32 %v910_v4, %v882_v45  ;;  %v885_v57 = vadd.f32 %v877_v18, %v849_v48  ;;  %v886_v7 = vadd.f32 %v878_v60, %v850_v49 }
 0x186   : > { %v950_v10 = vsel %vm942_vm15, %v2036_v56, 0.0 }
 0x189   : > { %v859_v23 = vpop.permute.xlu1 %858 }
 0x18a   : > { %vm867_vm6 = vcmp.eq.s32.totalorder %v1713_v20, %v859_v23  ;;  %vm868_vm7 = vcmp.eq.s32.totalorder %v1716_v21, %v859_v23 }
 0x18b   : > { %v875_v33 = vsel %vm867_vm6, %v2032_v53, 0.0  ;;  %v876_v31 = vsel %vm868_vm7, %v2036_v56, 0.0  ;;  %v925_v8 = vpop.permute.xlu2 %924 }
 0x18c   : > { %v883_v24 = vadd.f32 %v875_v33, %v847_v30  ;;  %v884_v14 = vadd.f32 %v876_v31, %v848_v58  ;;  %vm935_vm8 = vcmp.eq.s32.totalorder %v1713_v20, %v925_v8  ;;  %vm936_vm9 = vcmp.eq.s32.totalorder %v1716_v21, %v925_v8 }
 0x18d   : > { %v943_v36 = vsel %vm935_vm8, %v2032_v53, 0.0  ;;  %v944_v46 = vsel %vm936_vm9, %v2036_v56, 0.0 }
 0x18e   : > { %v919_v26 = vadd.f32 %v911_v16, %v883_v24  ;;  %v920_v28 = vadd.f32 %v912_v17, %v884_v14 }
 0x192   : > { %v889_v63 = vpop.permute.xlu1 %888 }
 0x193   : > { %vm899_vm10 = vcmp.eq.s32.totalorder %v1713_v20, %v889_v63  ;;  %vm900_vm11 = vcmp.eq.s32.totalorder %v1716_v21, %v889_v63  ;;  %v931_v50 = vpop.permute.xlu2 %930 }
 0x194   : > { %v907_v29 = vsel %vm899_vm10, %v2032_v53, 0.0  ;;  %v908_v13 = vsel %vm900_vm11, %v2036_v56, 0.0  ;;  %vm939_vm12 = vcmp.eq.s32.totalorder %v1713_v20, %v931_v50  ;;  %vm940_vm13 = vcmp.eq.s32.totalorder %v1716_v21, %v931_v50 }
 0x195   : > { %v915_v9 = vadd.f32 %v907_v29, %v2257_v37  ;;  %v916_v15 = vadd.f32 %v908_v13, %v2259_v38  ;;  %v947_v25 = vsel %vm939_vm12, %v2032_v53, 0.0  ;;  %v948_v34 = vsel %vm940_vm13, %v2036_v56, 0.0 }
 0x196   : > { %v2309_v30 = vadd.f32 %v947_v25, %v919_v26  ;;  %v2311_v58 = vadd.f32 %v948_v34, %v920_v28 }
 0x197   : > { %v951_v35 = vadd.f32 %v943_v36, %v915_v9  ;;  %v952_v32 = vadd.f32 %v944_v46, %v916_v15 }
 0x19a   : > { %v898_v41 = vpop.permute.xlu1 %897 }
 0x19b   : > { %vm905_vm0 = vcmp.eq.s32.totalorder %v1713_v20, %v898_v41  ;;  %vm906_vm1 = vcmp.eq.s32.totalorder %v1716_v21, %v898_v41  ;;  %v1068_v37 = vpop.permute.xlu2 %1067 }
 0x19c   : > { %v913_v38 = vsel %vm905_vm0, %v2032_v53, 0.0  ;;  %v914_v40 = vsel %vm906_vm1, %v2036_v56, 0.0  ;;  %v1075_v42 = vadd.s32 %v1068_v37, %v511_v6 }
 0x19d   : > { %v921_v43 = vadd.f32 %v913_v38, %v885_v57  ;;  %v922_v27 = vadd.f32 %v914_v40, %v886_v7 }
 0x19e   : > { %1080 = vperm.xlu2 %1441, %v1075_v42  }
 0x19f   : > { %v957_v45 = vadd.f32 %v949_v44, %v921_v43  ;;  %v958_v47 = vadd.f32 %v950_v10, %v922_v27 }
 0x1a3   : > { %v928_v54 = vpop.permute.xlu1 %927  ;;  %v1072_v59 = vpop.permute.xlu2 %1071 }
 0x1a4   : > { %vm937_vm2 = vcmp.eq.s32.totalorder %v1713_v20, %v928_v54  ;;  %vm938_vm3 = vcmp.eq.s32.totalorder %v1716_v21, %v928_v54  ;;  %v1077_v1 = vadd.s32 %v1072_v59, %v513_v5 }
 0x1a5   : > { %v945_v6 = vsel %vm937_vm2, %v2032_v53, 0.0  ;;  %v946_v48 = vsel %vm938_vm3, %v2036_v56, 0.0 }
 0x1a6   : > { %v953_v49 = vadd.f32 %v945_v6, %v2283_v61  ;;  %v954_v18 = vadd.f32 %v946_v48, %v2285_v55  ;;  %1089 = vperm.xlu2 %1441, %v1078_v52   ;;  %1086 = vperm.xlu1 %1443, %v1077_v1   ;;  %v970_v61 = vpop.permute.xlu0 %969 }
 0x1a7   : > { %vm977_vm6 = vcmp.eq.s32.totalorder %v1713_v20, %v970_v61  ;;  %vm978_vm7 = vcmp.eq.s32.totalorder %v1716_v21, %v970_v61 }
 0x1a8   : > { %v985_v7 = vsel %vm977_vm6, %v2032_v53, 0.0  ;;  %v986_v22 = vsel %vm978_vm7, %v2036_v56, 0.0 }
 0x1a9   : > { %v993_v33 = vadd.f32 %v985_v7, %v957_v45  ;;  %v994_v31 = vadd.f32 %v986_v22, %v958_v47 }
 0x1ab   : > { %v2333_v2 = vpop.permute.xlu2 %966 }
 0x1ac   : > { %v961_v11 = vpop.permute.xlu1 %960 }
 0x1ad   : > { %vm971_vm4 = vcmp.eq.s32.totalorder %v1713_v20, %v961_v11  ;;  %vm972_vm5 = vcmp.eq.s32.totalorder %v1716_v21, %v961_v11 }
 0x1ae   : > { %v979_v0 = vsel %vm971_vm4, %v2032_v53, 0.0  ;;  %v980_v5 = vsel %vm972_vm5, %v2036_v56, 0.0  ;;  %v1033_v36 = vpop.permute.xlu0 %1032 }
 0x1af   : > { %v987_v60 = vadd.f32 %v979_v0, %v951_v35  ;;  %v988_v62 = vadd.f32 %v980_v5, %v952_v32  ;;  %vm1043_vm0 = vcmp.eq.s32.totalorder %v1713_v20, %v1033_v36  ;;  %vm1044_vm1 = vcmp.eq.s32.totalorder %v1716_v21, %v1033_v36 }
 0x1b0   : > { %v1051_v41 = vsel %vm1043_vm0, %v2032_v53, 0.0  ;;  %v1052_v37 = vsel %vm1044_vm1, %v2036_v56, 0.0 }
 0x1b4   : > { %v1070_v4 = vpop.permute.xlu1 %1069  ;;  %v1000_v57 = vpop.permute.xlu2 %999 }
 0x1b5   : > { %v1076_v55 = vadd.s32 %v1070_v4, %v512_v12  ;;  %vm1009_vm8 = vcmp.eq.s32.totalorder %v1713_v20, %v1000_v57  ;;  %vm1010_vm9 = vcmp.eq.s32.totalorder %v1716_v21, %v1000_v57 }
 0x1b6   : > { %v1017_v63 = vsel %vm1009_vm8, %v2032_v53, 0.0  ;;  %v1018_v50 = vsel %vm1010_vm9, %v2036_v56, 0.0  ;;  %vm975_vm8 = vcmp.eq.s32.totalorder %v1713_v20, %v2333_v2  ;;  %vm976_vm9 = vcmp.eq.s32.totalorder %v1716_v21, %v2333_v2 }
 0x1b7   : > { %1083 = vperm.xlu0 %1442, %v1076_v55   ;;  %v983_v0 = vsel %vm975_vm8, %v2032_v53, 0.0  ;;  %v984_v5 = vsel %vm976_vm9, %v2036_v56, 0.0 }
 0x1b8   : > { %v991_v4 = vadd.f32 %v983_v0, %v2309_v30  ;;  %v992_v57 = vadd.f32 %v984_v5, %v2311_v58 }
 0x1bc   : > { %v964_v23 = vpop.permute.xlu1 %963  ;;  %v1006_v8 = vpop.permute.xlu2 %1005 }
 0x1bd   : > { %vm973_vm10 = vcmp.eq.s32.totalorder %v1713_v20, %v964_v23  ;;  %vm974_vm11 = vcmp.eq.s32.totalorder %v1716_v21, %v964_v23  ;;  %vm1013_vm12 = vcmp.eq.s32.totalorder %v1713_v20, %v1006_v8  ;;  %vm1014_vm13 = vcmp.eq.s32.totalorder %v1716_v21, %v1006_v8 }
 0x1be   : > { %v981_v3 = vsel %vm973_vm10, %v2032_v53, 0.0  ;;  %v982_v12 = vsel %vm974_vm11, %v2036_v56, 0.0  ;;  %v1021_v24 = vsel %vm1013_vm12, %v2032_v53, 0.0  ;;  %v1022_v14 = vsel %vm1014_vm13, %v2036_v56, 0.0 }
 0x1bf   : > { %v989_v16 = vadd.f32 %v981_v3, %v953_v49  ;;  %v990_v17 = vadd.f32 %v982_v12, %v954_v18  ;;  %v1029_v26 = vadd.f32 %v1021_v24, %v993_v33  ;;  %v1030_v28 = vadd.f32 %v1022_v14, %v994_v31 }
 0x1c1   : > { %v2361_v29 = vadd.f32 %v1017_v63, %v989_v16  ;;  %v2363_v13 = vadd.f32 %v1018_v50, %v990_v17 }
 0x1c5   : > { %v997_v9 = vpop.permute.xlu1 %996  ;;  %v1039_v34 = vpop.permute.xlu2 %1038 }
 0x1c6   : > { %vm1007_vm14 = vcmp.eq.s32.totalorder %v1713_v20, %v997_v9  ;;  %vm1008_vm15 = vcmp.eq.s32.totalorder %v1716_v21, %v997_v9  ;;  %vm1047_vm12 = vcmp.eq.s32.totalorder %v1713_v20, %v1039_v34  ;;  %vm1048_vm13 = vcmp.eq.s32.totalorder %v1716_v21, %v1039_v34 }
 0x1c7   : > { %v1015_v46 = vsel %vm1007_vm14, %v2032_v53, 0.0  ;;  %v1016_v39 = vsel %vm1008_vm15, %v2036_v56, 0.0  ;;  %v1055_v55 = vsel %vm1047_vm12, %v2032_v53, 0.0  ;;  %v1056_v7 = vsel %vm1048_vm13, %v2036_v56, 0.0 }
 0x1c8   : > { %v1023_v35 = vadd.f32 %v1015_v46, %v987_v60  ;;  %v1024_v32 = vadd.f32 %v1016_v39, %v988_v62 }
 0x1ca   : > { %v1059_v42 = vadd.f32 %v1051_v41, %v1023_v35  ;;  %v1060_v43 = vadd.f32 %v1052_v37, %v1024_v32 }
 0x1cd   : > { %v1003_v15 = vpop.permute.xlu1 %1002 }
 0x1ce   : > { %vm1011_vm10 = vcmp.eq.s32.totalorder %v1713_v20, %v1003_v15  ;;  %vm1012_vm11 = vcmp.eq.s32.totalorder %v1716_v21, %v1003_v15 }
 0x1cf   : > { %v1019_v60 = vsel %vm1011_vm10, %v2032_v53, 0.0  ;;  %v1020_v62 = vsel %vm1012_vm11, %v2036_v56, 0.0 }
 0x1d0   : > { %v1027_v2 = vadd.f32 %v1019_v60, %v991_v4  ;;  %v1028_v61 = vadd.f32 %v1020_v62, %v992_v57 }
 0x1d2   : > { %v1063_v23 = vadd.f32 %v1055_v55, %v1027_v2  ;;  %v1064_v33 = vadd.f32 %v1056_v7, %v1028_v61 }
 0x1d6   : > { %v2365_v25 = vpop.permute.xlu1 %1035 }
 0x1d7   : > { %vm1045_vm0 = vcmp.eq.s32.totalorder %v1713_v20, %v2365_v25  ;;  %vm1046_vm1 = vcmp.eq.s32.totalorder %v1716_v21, %v2365_v25 }
 0x1d8   : > { %v1053_v12 = vsel %vm1045_vm0, %v2032_v53, 0.0  ;;  %v1054_v24 = vsel %vm1046_vm1, %v2036_v56, 0.0 }
 0x1d9   : > { %v1061_v16 = vadd.f32 %v1053_v12, %v2361_v29  ;;  %v1062_v17 = vadd.f32 %v1054_v24, %v2363_v13 }
 0x1de   : > { %v1042_v38 = vpop.permute.xlu1 %1041 }
 0x1df   : > { %vm1049_vm4 = vcmp.eq.s32.totalorder %v1713_v20, %v1042_v38  ;;  %vm1050_vm5 = vcmp.eq.s32.totalorder %v1716_v21, %v1042_v38 }
 0x1e0   : > { %v1057_v51 = vsel %vm1049_vm4, %v2032_v53, 0.0  ;;  %v1058_v52 = vsel %vm1050_vm5, %v2036_v56, 0.0  ;;  %vm499_vm4 = vcmask 1040384   ;;  %vm504_vm5 = vcmp.lt.s32.totalorder %v199_v19, 256 }
 0x1e1   : > { %v1065_v59 = vadd.f32 %v1057_v51, %v1029_v26  ;;  %v1066_v1 = vadd.f32 %v1058_v52, %v1030_v28 }
 0x1f8   : > { %v1081_v40 = vpop.permute.xlu2 %1080 }
 0x1f9   : > { %vm1091_vm2 = vcmp.eq.s32.totalorder %v1713_v20, %v1081_v40  ;;  %vm1092_vm3 = vcmp.eq.s32.totalorder %v1716_v21, %v1081_v40 }
 0x1fa   : > { %v1099_v27 = vsel %vm1091_vm2, %v2032_v53, 0.0  ;;  %v1100_v44 = vsel %vm1092_vm3, %v2036_v56, 0.0 }
 0x1fb   : > { %v1107_v10 = vadd.f32 %v1099_v27, %v1059_v42  ;;  %v1108_v45 = vadd.f32 %v1100_v44, %v1060_v43 }
 0x1fd   : > { %v1115_v47 = vadd.f32 %v1108_v45, %v1107_v10 }
 0x1ff   : > { %1116 = vadd.xlane.f32.xlu1 %v1115_v47 }
 0x200   : > { %v1090_v54 = vpop.permute.xlu2 %1089 }
 0x201   : > { %vm1097_vm6 = vcmp.eq.s32.totalorder %v1713_v20, %v1090_v54  ;;  %vm1098_vm7 = vcmp.eq.s32.totalorder %v1716_v21, %v1090_v54 }
 0x202   : > { %v1105_v6 = vsel %vm1097_vm6, %v2032_v53, 0.0  ;;  %v1106_v48 = vsel %vm1098_vm7, %v2036_v56, 0.0 }
 0x203   : > { %v1113_v49 = vadd.f32 %v1105_v6, %v1065_v59  ;;  %v1114_v18 = vadd.f32 %v1106_v48, %v1066_v1 }
 0x205   : > { %v1124_v11 = vadd.f32 %v1114_v18, %v1113_v49 }
 0x218   : > { %v1087_v22 = vpop.permute.xlu1 %1086 }
 0x219   : > { %vm1095_vm14 = vcmp.eq.s32.totalorder %v1713_v20, %v1087_v22  ;;  %vm1096_vm15 = vcmp.eq.s32.totalorder %v1716_v21, %v1087_v22 }
 0x21a   : > { %v1103_v30 = vsel %vm1095_vm14, %v2032_v53, 0.0  ;;  %v1104_v58 = vsel %vm1096_vm15, %v2036_v56, 0.0 }
 0x21b   : > { %v1111_v31 = vadd.f32 %v1103_v30, %v1063_v23  ;;  %v1112_v8 = vadd.f32 %v1104_v58, %v1064_v33 }
 0x21d   : > { %v1121_v3 = vadd.f32 %v1112_v8, %v1111_v31 }
 0x21f   : > { %1122 = vadd.xlane.f32.xlu0 %v1121_v3 }
 0x229   : > { %v1084_v14 = vpop.permute.xlu0 %1083 }
 0x22a   : > { %vm1093_vm2 = vcmp.eq.s32.totalorder %v1713_v20, %v1084_v14  ;;  %vm1094_vm3 = vcmp.eq.s32.totalorder %v1716_v21, %v1084_v14  ;;  %v498_v20 = vrot.slane %v2036_v56, 7 }
 0x22b   : > { %v1101_v26 = vsel %vm1093_vm2, %v2032_v53, 0.0  ;;  %v1102_v28 = vsel %vm1094_vm3, %v2036_v56, 0.0 }
 0x22c   : > { %v1109_v63 = vadd.f32 %v1101_v26, %v1061_v16  ;;  %v1110_v50 = vadd.f32 %v1102_v28, %v1062_v17  ;;  %v500_v21 = vsel %vm499_vm4, %v2032_v53, %v498_v20 }
 0x22d   : > { %506 = vst.msk [vmem:[%s191_s24] sm:$0x3] %vm504_vm5, %v500_v21 }
 0x22e   : > { %v1118_v9 = vadd.f32 %v1110_v50, %v1109_v63 }
 0x230   : > { %1119 = vadd.xlane.f32.xlu2 %v1118_v9 }
 0x238   : > { %1125 = vadd.xlane.f32.xlu2 %v1124_v11 }
 0x272   : > { %v1117_v29 = vpop.xlane.xlu1 %1116 }
 0x273   : > { %1127 = vst [vmem:[%s2423_s9] sm:$0xff] %v1117_v29 }
 0x274   : > { %1493 = shalt.err (!%p1490_p8)
}
 0x275   : > { %1327 = dma.vmem_to_hbm [thread:$0]  (%p1647_p5), %s1167_s25, 32, %s1169_s26, %s1137_s27  }
 0x276   : > { %s1321_s10 = sshll.u32 %s1630_s16, 5  ;;  %s1149_s20 = sshll.u32 %s2423_s9, 4  ;;  %s1150_s20 = int_to_ptr.vmem [resolvable:$true] %s1149_s20 }
 0x277   : > { %s1148_s19 = scalar_lea.hbm %s2483_s2, %s1321_s10  ;;  %s1132_s28 = scalar_lea.sflag [#allocation3], %s2420_s7 }
 0x278   : > { %s1151_s24 = sshll.u32 %s1148_s19, 4  ;;  %s1514_s27 = scalar_lea.hbm %s2483_s2, 64  ;;  %s1152_s24 = int_to_ptr.hbm [resolvable:$true] %s1151_s24 }
 0x279   : > { %s1508_s29 = sshra.s32 %s1152_s24, 4  ;;  %s1509_s29 = int_to_ptr.hbm [resolvable:$true] %s1508_s29 }
 0x27a   : > { %s1510_s25 = scalar_lea.hbm %s1509_s29, 32  ;;  %p1515_p12 = scmp.lt.s32.totalorder %s1509_s29, %s2483_s2 }
 0x27b   : > { %p1511_p9 = scmp.ne.s32.totalorder %s1509_s29, %s1510_s25  ;;  %p1516_p13 = scmp.lt.s32.totalorder %s1514_s27, %s1510_s25 }
 0x27d   : > { %p1512_p10 = pnand %p1511_p9, %p1647_p5  ;;  %p1517_p0 = por %p1516_p13, %p1515_p12 }
 0x27f   : > { %p1513_p11 = pneg %p1512_p10 }
 0x281   : > { %p1518_p1 = pnand %p1517_p0, %p1513_p11 }
 0x292   : > { %v1123_v19 = vpop.xlane.xlu0 %1122 }
 0x293   : > { %1129 = vst [vmem:[%s2423_s9 + $0x10] sm:$0xff] %v1123_v19 }
 0x2a3   : > { %v1120_v53 = vpop.xlane.xlu2 %1119 }
 0x2a4   : > { %1128 = vst [vmem:[%s2423_s9 + $0x8] sm:$0xff] %v1120_v53 }
 0x2ab   : > { %v1126_v56 = vpop.xlane.xlu2 %1125 }
 0x2ac   : > { %1130 = vst [vmem:[%s2423_s9 + $0x18] sm:$0xff] %v1126_v56 }
 0x2ad   : > { %1521 = shalt.err (!%p1518_p1)
}
 0x2ae   : > { %s1587_s7 = smov 128   ;;  %s1588_s9 = smov 8  }
 0x2af   : > { %1326 = dma.vmem_to_hbm [thread:$0]  (%p1647_p5), %s1150_s20, 512, %s1152_s24, %s1132_s28, %s1587_s7, %s1587_s7, %s1588_s9  }
 0x2b0 PF: > { %p1343_p2 = scmp.ge.s32.totalorder %s1564_s15, 2  ;;  %s1180_s5 = sand.u32 1, %s1552_s12  }
 0x2b1   : > { %s1181_s6 = scalar_lea.sflag [#allocation3], %s1180_s5 }
 0x2b2   : > { %p1335_p3 = pnand %p1343_p2, %p1651_p6 }
 0x2b4   : > { %p1336_p4 = pneg %p1335_p3 }
 0x2b6   : > { %1543 = dma.done.wait (%p1336_p4), %s1181_s6, 512  }
 0x2b7   : > { %1545 = vsyncadd (%p1336_p4), %s1181_s6, 4294966784  ;;  %s1191_s8 = scalar_lea.sflag [#allocation7], %s1180_s5 }
 0x2b8   : > { %1547 = dma.done.wait (%p1336_p4), %s1191_s8, 32  }
 0x2b9   : > { %1549 = vsyncadd (%p1336_p4), %s1191_s8, 4294967264  ;;  %p18_p5 = scmp.ge.s32.totalorder %s1634_s18, 4   ;;  %s2487_s12 = smov %s1556_s13 }
 0x2ba   : > { %s2488_s13 = smov %s1560_s14  ;;  %s2489_s14 = smov %s1645_s21 }
 0x2bb   : > { %s2490_s15 = smov %s1634_s18  ;;  %20 = sbr.rel (!%p18_p5) target bundleno = 6 (0x6), region = 85 }
 0x2c0   :  { %1197 = vsyncpa [#allocation3], 1 }
 0x2c1   :  { %1199 = vsyncpa [#allocation3 + $0x1], 1 }
 0x2c2   :  { %1200 = vsyncpa [#allocation7], 1 }
 0x2c3   :  { %1202 = vsyncpa [#allocation7 + $0x1], 1 }
 0x2c4   :  { %1203 = vsyncpa [#allocation4], 1 }
 0x2c5   :  { %1205 = vsyncpa [#allocation4 + $0x1], 1 }

</bundles_post_ra>
